<compile_context>
chip_gen: v7x
topology: tpu7x:2x2x1
jax: 0.10.0
libtpu: 0.0.40
codegen_flags: <defaults>
</compile_context>

<pallas_src>
import numpy as np
import jax
import jax.numpy as jnp
from jax import lax
from jax.experimental import pallas as pl
from jax.experimental.pallas import tpu as pltpu


# --------------------------------------------------------------------------
# Fused Pallas kernel (one image per grid step)
# --------------------------------------------------------------------------
def _last_octave_kernel(xhf_ref, xl_ref, wwh_ref, wwl_ref, o_ref):
    """Fused LastOctaveConv forward for one image (width-folded output).

    xhf_ref : (1, H+2, W/2+1, 2*Ch)  zero-padded X_h with column parity folded
              into lanes: xhf[0, r, j, p*Ch + c] == xh_pad[r, 2*j + p, c]
    xl_ref  : (1, H/2+2, W/2+2, Cl)  zero-padded X_l
    wwh_ref : (12*Ch, 2*Cout)  block-Toeplitz high weights; K order (dy,jj,p,cin),
              N order (output parity b, cout)
    wwl_ref : (9*Cl, 2*Cout)   low weights, K order (dy,dx,cin); columns
              duplicated across both parities (implicit nearest-2x width upsample)
    o_ref   : (1, H, W/2, 2*Cout)  folded output:
              o[0, i, q, b*Cout + c] == y[i, 2*q + b, c]
    """
    _, h_p2, wl_p1, _ = xhf_ref.shape
    h, wl = h_p2 - 2, wl_p1 - 1
    hl = h // 2
    n2 = wwh_ref.shape[-1]                       # 2 * Cout

    # ---- high branch: single MXU matmul, K = 3*2*(2*Ch), N = 2*Cout --------
    parts_h = [xhf_ref[0, dy:dy + h, jj:jj + wl, :]
               for dy in range(3) for jj in range(2)]
    lhs_h = jnp.concatenate(parts_h, axis=-1)              # (H, W/2, 12*Ch)
    acc_h = jnp.dot(lhs_h.reshape(h * wl, lhs_h.shape[-1]),
                    wwh_ref[...], preferred_element_type=jnp.float32)

    # ---- low branch: single MXU matmul, K = 9*Cl, N = 2*Cout ---------------
    parts_l = [xl_ref[0, dy:dy + hl, dx:dx + wl, :]
               for dy in range(3) for dx in range(3)]
    lhs_l = jnp.concatenate(parts_l, axis=-1)              # (H/2, W/2, 9*Cl)
    acc_l = jnp.dot(lhs_l.reshape(hl * wl, lhs_l.shape[-1]),
                    wwl_ref[...], preferred_element_type=jnp.float32)

    # ---- sum: nearest-2x height upsample fused into the add (leading-dim
    #      broadcast); width upsample is already implicit in the folded layout.
    out = acc_h.reshape(hl, 2, wl, n2) + acc_l.reshape(hl, 1, wl, n2)
    o_ref[0] = out.reshape(h, wl, n2).astype(o_ref.dtype)


# --------------------------------------------------------------------------
# One-time weight packing (hoist out of the per-call path)
# --------------------------------------------------------------------------
def pack_last_octave_weights(w_h2h, w_l2h, dtype=jnp.bfloat16):
    """Repack PyTorch-layout (Cout, Cin, 3, 3) conv weights for the kernel."""
    c_out, c_h = w_h2h.shape[0], w_h2h.shape[1]
    c_l = w_l2h.shape[1]

    # High branch: block-Toeplitz wide weight for the parity-folded (f=2)
    # input/output layout.  K order (dy, jj, p, cin); N order (b, cout) where
    # the effective tap is dx = 2*jj + p - b (zero outside [0, 3)).
    wh = jnp.transpose(w_h2h, (2, 3, 1, 0))                # (dy, dx, cin, cout)
    zero = jnp.zeros((c_h, c_out), wh.dtype)
    blocks = []
    for dy in range(3):
        for jj in range(2):
            for p in range(2):
                cols = []
                for b in range(2):
                    dx = 2 * jj + p - b
                    cols.append(wh[dy, dx] if 0 <= dx <= 2 else zero)
                blocks.append(jnp.concatenate(cols, axis=-1))   # (Ch, 2*Cout)
    wwh = jnp.concatenate(blocks, axis=0).astype(dtype)         # (12*Ch, 2*Cout)

    # Low branch: plain 9-tap fold; duplicate the output columns across both
    # parities so the nearest-2x WIDTH upsample is free in the folded layout.
    wl_mat = jnp.transpose(w_l2h, (2, 3, 1, 0)).reshape(9 * c_l, c_out)
    wwl = jnp.concatenate([wl_mat, wl_mat], axis=-1).astype(dtype)  # (9*Cl, 2*Cout)
    return wwh, wwl


# --------------------------------------------------------------------------
# Wrapper (cheap layout plumbing only: pad + free reshapes + bf16 cast)
# --------------------------------------------------------------------------
def avg_pool2(x):  # nn.AvgPool2d(kernel=2, stride=2), NHWC — stride==2 path only
    n, h, w, c = x.shape
    return x.reshape(n, h // 2, 2, w // 2, 2, c).mean(axis=(2, 4))


def last_octave_conv_forward(x_h, x_l, wwh, wwl, stride=1):
    """x_h: (N,H,W,Ch), x_l: (N,H/2,W/2,Cl) NHWC; wwh/wwl from
    pack_last_octave_weights.  Returns y: (N, H, W, Cout) float32."""
    if stride == 2:
        x_h, x_l = avg_pool2(x_h), avg_pool2(x_l)

    n, h, w, c_h = x_h.shape
    _, hl, wl, c_l = x_l.shape
    assert h == 2 * hl and w == 2 * wl and w % 2 == 0
    c_out2 = wwh.shape[-1]
    c_out = c_out2 // 2
    cdt = wwh.dtype                                      # bf16 activations

    # Zero-pad; parity-fold X_h columns into lanes via a FREE contiguous view.
    xh_f = jnp.pad(x_h.astype(cdt), ((0, 0), (1, 1), (1, 1), (0, 0)))
    xh_f = xh_f.reshape(n, h + 2, wl + 1, 2 * c_h)
    xl_p = jnp.pad(x_l.astype(cdt), ((0, 0), (1, 1), (1, 1), (0, 0)))

    # TODO(synk): for production-size feature maps (e.g. 128x128, 128+ channels)
    # add a row-tiled, halo-aware grid axis (manual DMA / element-offset blocks)
    # and raise vmem_limit_bytes; the per-image blocks at these test sizes fit
    # the default scoped VMEM comfortably.
    folded = pl.pallas_call(
        _last_octave_kernel,
        out_shape=jax.ShapeDtypeStruct((n, h, wl, c_out2), jnp.float32),
        grid_spec=pltpu.PrefetchScalarGridSpec(
            num_scalar_prefetch=0,
            grid=(n,),
            in_specs=[
                pl.BlockSpec((1, h + 2, wl + 1, 2 * c_h), lambda i: (i, 0, 0, 0)),
                pl.BlockSpec((1, hl + 2, wl + 2, c_l), lambda i: (i, 0, 0, 0)),
                pl.BlockSpec((12 * c_h, c_out2), lambda i: (0, 0)),
                pl.BlockSpec((9 * c_l, c_out2), lambda i: (0, 0)),
            ],
            out_specs=pl.BlockSpec((1, h, wl, c_out2), lambda i: (i, 0, 0, 0)),
        ),
        compiler_params=pltpu.CompilerParams(
            dimension_semantics=("parallel",)),
    )(xh_f, xl_p, wwh, wwl)

    # Free contiguous view: (N, H, W/2, 2*Cout) -> (N, H, W, Cout).
    return folded.reshape(n, h, w, c_out)


# --------------------------------------------------------------------------
# Pure-JAX reference (exact f32) for correctness check
# --------------------------------------------------------------------------
def _conv_ref(x_nhwc, w_oihw):
    return lax.conv_general_dilated(
        x_nhwc, jnp.transpose(w_oihw, (2, 3, 1, 0)),
        window_strides=(1, 1), padding="SAME",
        dimension_numbers=("NHWC", "HWIO", "NHWC"),
        precision=lax.Precision.HIGHEST)


def _ref_forward(x_h, x_l, w_h2h, w_l2h, stride=1):
    if stride == 2:
        x_h, x_l = avg_pool2(x_h), avg_pool2(x_l)
    x_l2h = _conv_ref(x_l, w_l2h)
    x_h2h = _conv_ref(x_h, w_h2h)
    x_l2h = jnp.repeat(jnp.repeat(x_l2h, 2, axis=1), 2, axis=2)   # nearest 2x
    return x_h2h + x_l2h


# --------------------------------------------------------------------------
# Main
# --------------------------------------------------------------------------
if __name__ == "__main__":
    key = jax.random.PRNGKey(0)
    in_channels, out_channels, alpha = 8, 8, 0.5
    c_l_in = int(alpha * in_channels)
    c_h_in = in_channels - c_l_in
    n, h, w = 2, 16, 16

    ks = jax.random.split(key, 4)
    # NHWC inputs (equivalent PyTorch NCHW shapes: X_h (2,4,16,16), X_l (2,4,8,8)).
    x_h = jax.random.normal(ks[0], (n, h, w, c_h_in), jnp.float32)
    x_l = jax.random.normal(ks[1], (n, h // 2, w // 2, c_l_in), jnp.float32)
    # Conv weights in PyTorch (Cout, Cin, kh, kw) layout, bias=False.
    w_l2h = 0.1 * jax.random.normal(ks[2], (out_channels, c_l_in, 3, 3), jnp.float32)
    w_h2h = 0.1 * jax.random.normal(ks[3], (out_channels, c_h_in, 3, 3), jnp.float32)

    # One-time weight packing (module-init equivalent).
    wwh, wwl = pack_last_octave_weights(w_h2h, w_l2h)

    y = last_octave_conv_forward(x_h, x_l, wwh, wwl, stride=1)
    jax.block_until_ready(y)

    y_ref = _ref_forward(x_h, x_l, w_h2h, w_l2h, stride=1)
    np.testing.assert_allclose(np.asarray(y), np.asarray(y_ref), rtol=2e-2, atol=2e-2)

    print("KERNEL_OK")
</pallas_src>

<mosaic_0001>
module attributes {stable_mosaic.version = 11 : i64} {
  func.func @_last_octave_kernel(%arg0: i32, %arg1: memref<1x18x9x8xbf16, #tpu.memory_space<vmem>>, %arg2: memref<1x10x10x4xbf16, #tpu.memory_space<vmem>>, %arg3: memref<48x16xbf16, #tpu.memory_space<vmem>>, %arg4: memref<36x16xbf16, #tpu.memory_space<vmem>>, %arg5: memref<1x16x8x16xf32, #tpu.memory_space<vmem>>) attributes {dimension_semantics = [#tpu.dimension_semantics<parallel>], iteration_bounds = array<i64: 2>, scalar_prefetch = 0 : i64, scratch_operands = 0 : i64, tpu.core_type = #tpu.core_type<tc>, window_params = [{transform_indices = @transform_0, window_bounds = array<i64: 1, 18, 9, 8>}, {transform_indices = @transform_1, window_bounds = array<i64: 1, 10, 10, 4>}, {pipeline_mode = #tpu.pipeline_mode<synchronous>, transform_indices = @transform_2, window_bounds = array<i64: 48, 16>}, {pipeline_mode = #tpu.pipeline_mode<synchronous>, transform_indices = @transform_3, window_bounds = array<i64: 36, 16>}, {transform_indices = @transform_4, window_bounds = array<i64: 1, 16, 8, 16>}]} {
    %c0 = arith.constant 0 : index
    %c0_0 = arith.constant 0 : index
    %c0_1 = arith.constant 0 : index
    %c0_2 = arith.constant 0 : index
    %0 = vector.load %arg1[%c0, %c0_0, %c0_1, %c0_2] : memref<1x18x9x8xbf16, #tpu.memory_space<vmem>>, vector<1x16x8x8xbf16>
    %1 = vector.shape_cast %0 : vector<1x16x8x8xbf16> to vector<16x8x8xbf16>
    %c0_3 = arith.constant 0 : index
    %c0_4 = arith.constant 0 : index
    %c1 = arith.constant 1 : index
    %c0_5 = arith.constant 0 : index
    %2 = vector.load %arg1[%c0_3, %c0_4, %c1, %c0_5] : memref<1x18x9x8xbf16, #tpu.memory_space<vmem>>, vector<1x16x8x8xbf16>
    %3 = vector.shape_cast %2 : vector<1x16x8x8xbf16> to vector<16x8x8xbf16>
    %c0_6 = arith.constant 0 : index
    %c1_7 = arith.constant 1 : index
    %c0_8 = arith.constant 0 : index
    %c0_9 = arith.constant 0 : index
    %4 = vector.load %arg1[%c0_6, %c1_7, %c0_8, %c0_9] : memref<1x18x9x8xbf16, #tpu.memory_space<vmem>>, vector<1x16x8x8xbf16>
    %5 = vector.shape_cast %4 : vector<1x16x8x8xbf16> to vector<16x8x8xbf16>
    %c0_10 = arith.constant 0 : index
    %c1_11 = arith.constant 1 : index
    %c1_12 = arith.constant 1 : index
    %c0_13 = arith.constant 0 : index
    %6 = vector.load %arg1[%c0_10, %c1_11, %c1_12, %c0_13] : memref<1x18x9x8xbf16, #tpu.memory_space<vmem>>, vector<1x16x8x8xbf16>
    %7 = vector.shape_cast %6 : vector<1x16x8x8xbf16> to vector<16x8x8xbf16>
    %c0_14 = arith.constant 0 : index
    %c2 = arith.constant 2 : index
    %c0_15 = arith.constant 0 : index
    %c0_16 = arith.constant 0 : index
    %8 = vector.load %arg1[%c0_14, %c2, %c0_15, %c0_16] : memref<1x18x9x8xbf16, #tpu.memory_space<vmem>>, vector<1x16x8x8xbf16>
    %9 = vector.shape_cast %8 : vector<1x16x8x8xbf16> to vector<16x8x8xbf16>
    %c0_17 = arith.constant 0 : index
    %c2_18 = arith.constant 2 : index
    %c1_19 = arith.constant 1 : index
    %c0_20 = arith.constant 0 : index
    %10 = vector.load %arg1[%c0_17, %c2_18, %c1_19, %c0_20] : memref<1x18x9x8xbf16, #tpu.memory_space<vmem>>, vector<1x16x8x8xbf16>
    %11 = vector.shape_cast %10 : vector<1x16x8x8xbf16> to vector<16x8x8xbf16>
    %12 = tpu.concatenate %1, %3, %5, %7, %9, %11 in 2 : vector<16x8x8xbf16>, vector<16x8x8xbf16>, vector<16x8x8xbf16>, vector<16x8x8xbf16>, vector<16x8x8xbf16>, vector<16x8x8xbf16> -> vector<16x8x48xbf16>
    %13 = vector.shape_cast %12 : vector<16x8x48xbf16> to vector<128x48xbf16>
    %c0_21 = arith.constant 0 : index
    %c0_22 = arith.constant 0 : index
    %14 = vector.load %arg3[%c0_21, %c0_22] : memref<48x16xbf16, #tpu.memory_space<vmem>>, vector<48x16xbf16>
    %cst = arith.constant dense<0.000000e+00> : vector<128x16xf32>
    %15 = tpu.matmul %13, %14, %cst {dimension_numbers = #tpu.dot_dimension_numbers<[1], [0], [0], [1], [0, 0, 1, 1], [], []>} : vector<128x48xbf16>, vector<48x16xbf16>, vector<128x16xf32> -> vector<128x16xf32>
    %c0_23 = arith.constant 0 : index
    %c0_24 = arith.constant 0 : index
    %c0_25 = arith.constant 0 : index
    %c0_26 = arith.constant 0 : index
    %16 = vector.load %arg2[%c0_23, %c0_24, %c0_25, %c0_26] : memref<1x10x10x4xbf16, #tpu.memory_space<vmem>>, vector<1x8x8x4xbf16>
    %17 = vector.shape_cast %16 : vector<1x8x8x4xbf16> to vector<8x8x4xbf16>
    %c0_27 = arith.constant 0 : index
    %c0_28 = arith.constant 0 : index
    %c1_29 = arith.constant 1 : index
    %c0_30 = arith.constant 0 : index
    %18 = vector.load %arg2[%c0_27, %c0_28, %c1_29, %c0_30] : memref<1x10x10x4xbf16, #tpu.memory_space<vmem>>, vector<1x8x8x4xbf16>
    %19 = vector.shape_cast %18 : vector<1x8x8x4xbf16> to vector<8x8x4xbf16>
    %c0_31 = arith.constant 0 : index
    %c0_32 = arith.constant 0 : index
    %c2_33 = arith.constant 2 : index
    %c0_34 = arith.constant 0 : index
    %20 = vector.load %arg2[%c0_31, %c0_32, %c2_33, %c0_34] : memref<1x10x10x4xbf16, #tpu.memory_space<vmem>>, vector<1x8x8x4xbf16>
    %21 = vector.shape_cast %20 : vector<1x8x8x4xbf16> to vector<8x8x4xbf16>
    %c0_35 = arith.constant 0 : index
    %c1_36 = arith.constant 1 : index
    %c0_37 = arith.constant 0 : index
    %c0_38 = arith.constant 0 : index
    %22 = vector.load %arg2[%c0_35, %c1_36, %c0_37, %c0_38] : memref<1x10x10x4xbf16, #tpu.memory_space<vmem>>, vector<1x8x8x4xbf16>
    %23 = vector.shape_cast %22 : vector<1x8x8x4xbf16> to vector<8x8x4xbf16>
    %c0_39 = arith.constant 0 : index
    %c1_40 = arith.constant 1 : index
    %c1_41 = arith.constant 1 : index
    %c0_42 = arith.constant 0 : index
    %24 = vector.load %arg2[%c0_39, %c1_40, %c1_41, %c0_42] : memref<1x10x10x4xbf16, #tpu.memory_space<vmem>>, vector<1x8x8x4xbf16>
    %25 = vector.shape_cast %24 : vector<1x8x8x4xbf16> to vector<8x8x4xbf16>
    %c0_43 = arith.constant 0 : index
    %c1_44 = arith.constant 1 : index
    %c2_45 = arith.constant 2 : index
    %c0_46 = arith.constant 0 : index
    %26 = vector.load %arg2[%c0_43, %c1_44, %c2_45, %c0_46] : memref<1x10x10x4xbf16, #tpu.memory_space<vmem>>, vector<1x8x8x4xbf16>
    %27 = vector.shape_cast %26 : vector<1x8x8x4xbf16> to vector<8x8x4xbf16>
    %c0_47 = arith.constant 0 : index
    %c2_48 = arith.constant 2 : index
    %c0_49 = arith.constant 0 : index
    %c0_50 = arith.constant 0 : index
    %28 = vector.load %arg2[%c0_47, %c2_48, %c0_49, %c0_50] : memref<1x10x10x4xbf16, #tpu.memory_space<vmem>>, vector<1x8x8x4xbf16>
    %29 = vector.shape_cast %28 : vector<1x8x8x4xbf16> to vector<8x8x4xbf16>
    %c0_51 = arith.constant 0 : index
    %c2_52 = arith.constant 2 : index
    %c1_53 = arith.constant 1 : index
    %c0_54 = arith.constant 0 : index
    %30 = vector.load %arg2[%c0_51, %c2_52, %c1_53, %c0_54] : memref<1x10x10x4xbf16, #tpu.memory_space<vmem>>, vector<1x8x8x4xbf16>
    %31 = vector.shape_cast %30 : vector<1x8x8x4xbf16> to vector<8x8x4xbf16>
    %c0_55 = arith.constant 0 : index
    %c2_56 = arith.constant 2 : index
    %c2_57 = arith.constant 2 : index
    %c0_58 = arith.constant 0 : index
    %32 = vector.load %arg2[%c0_55, %c2_56, %c2_57, %c0_58] : memref<1x10x10x4xbf16, #tpu.memory_space<vmem>>, vector<1x8x8x4xbf16>
    %33 = vector.shape_cast %32 : vector<1x8x8x4xbf16> to vector<8x8x4xbf16>
    %34 = tpu.concatenate %17, %19, %21, %23, %25, %27, %29, %31, %33 in 2 : vector<8x8x4xbf16>, vector<8x8x4xbf16>, vector<8x8x4xbf16>, vector<8x8x4xbf16>, vector<8x8x4xbf16>, vector<8x8x4xbf16>, vector<8x8x4xbf16>, vector<8x8x4xbf16>, vector<8x8x4xbf16> -> vector<8x8x36xbf16>
    %35 = vector.shape_cast %34 : vector<8x8x36xbf16> to vector<64x36xbf16>
    %c0_59 = arith.constant 0 : index
    %c0_60 = arith.constant 0 : index
    %36 = vector.load %arg4[%c0_59, %c0_60] : memref<36x16xbf16, #tpu.memory_space<vmem>>, vector<36x16xbf16>
    %cst_61 = arith.constant dense<0.000000e+00> : vector<64x16xf32>
    %37 = tpu.matmul %35, %36, %cst_61 {dimension_numbers = #tpu.dot_dimension_numbers<[1], [0], [0], [1], [0, 0, 1, 1], [], []>} : vector<64x36xbf16>, vector<36x16xbf16>, vector<64x16xf32> -> vector<64x16xf32>
    %38 = vector.shape_cast %15 : vector<128x16xf32> to vector<8x2x8x16xf32>
    %39 = vector.shape_cast %37 : vector<64x16xf32> to vector<8x1x8x16xf32>
    %40 = vector.broadcast %39 : vector<8x1x8x16xf32> to vector<8x2x8x16xf32>
    %41 = arith.addf %38, %40 : vector<8x2x8x16xf32>
    %42 = vector.shape_cast %41 : vector<8x2x8x16xf32> to vector<16x8x16xf32>
    %c0_62 = arith.constant 0 : index
    %c0_63 = arith.constant 0 : index
    %c0_64 = arith.constant 0 : index
    %c0_65 = arith.constant 0 : index
    %43 = vector.load %arg5[%c0_62, %c0_63, %c0_64, %c0_65] : memref<1x16x8x16xf32, #tpu.memory_space<vmem>>, vector<1x16x8x16xf32>
    %44 = vector.shape_cast %43 : vector<1x16x8x16xf32> to vector<16x8x16xf32>
    %45 = vector.shape_cast %42 : vector<16x8x16xf32> to vector<1x16x8x16xf32>
    tpu.vector_store %arg5[%c0_62, %c0_63, %c0_64, %c0_65], %45 {strides = array<i32>} : memref<1x16x8x16xf32, #tpu.memory_space<vmem>>, vector<1x16x8x16xf32>,
    return
  }
  func.func @transform_0(%arg0: i32) -> (i32, i32, i32, i32) {
    %c0_i32 = arith.constant 0 : i32
    %c0_i32_0 = arith.constant 0 : i32
    %c0_i32_1 = arith.constant 0 : i32
    %c0_i32_2 = arith.constant 0 : i32
    return %arg0, %c0_i32, %c0_i32_0, %c0_i32_1 : i32, i32, i32, i32
  }
  func.func @transform_1(%arg0: i32) -> (i32, i32, i32, i32) {
    %c0_i32 = arith.constant 0 : i32
    %c0_i32_0 = arith.constant 0 : i32
    %c0_i32_1 = arith.constant 0 : i32
    %c0_i32_2 = arith.constant 0 : i32
    return %arg0, %c0_i32, %c0_i32_0, %c0_i32_1 : i32, i32, i32, i32
  }
  func.func @transform_2(%arg0: i32) -> (i32, i32) {
    %c0_i32 = arith.constant 0 : i32
    %c0_i32_0 = arith.constant 0 : i32
    %c0_i32_1 = arith.constant 0 : i32
    return %c0_i32, %c0_i32_0 : i32, i32
  }
  func.func @transform_3(%arg0: i32) -> (i32, i32) {
    %c0_i32 = arith.constant 0 : i32
    %c0_i32_0 = arith.constant 0 : i32
    %c0_i32_1 = arith.constant 0 : i32
    return %c0_i32, %c0_i32_0 : i32, i32
  }
  func.func @transform_4(%arg0: i32) -> (i32, i32, i32, i32) {
    %c0_i32 = arith.constant 0 : i32
    %c0_i32_0 = arith.constant 0 : i32
    %c0_i32_1 = arith.constant 0 : i32
    %c0_i32_2 = arith.constant 0 : i32
    return %arg0, %c0_i32, %c0_i32_0, %c0_i32_1 : i32, i32, i32, i32
  }
}

</mosaic_0001>

<bundles_post_ra>
// kernel: tpu_custom_call.1
= control target key start
LH: loop header
LB: loop body
LE: loop exit
PB: predicated region body
PF: predicated region fallthrough
CT: control target
= control target key end

     0   :  { %9 = vsyncpa [#allocation3], 0  ;;  %s4094_s0 = inlined_call_operand.vmem [shape: bf16[2,18,9,8], index: 0, kind: input, shape index: {}]   ;;  %s4095_s1 = inlined_call_operand.vmem [shape: bf16[2,10,10,4], index: 1, kind: input, shape index: {}]   ;;  %s4096_s2 = inlined_call_operand.vmem [shape: bf16[48,16], index: 2, kind: input, shape index: {}]   ;;  %s4097_s3 = inlined_call_operand.vmem [shape: bf16[36,16], index: 3, kind: input, shape index: {}]   ;;  %s4098_s4 = inlined_call_operand.hbm [shape: f32[2,16,8,16], index: 4, kind: output, shape index: {}]  }
   0x1   :  { %11 = vsyncpa [#allocation3 + $0x1], 0  ;;  %s3101_s15 = smov 0   ;;  %s3103_s16 = smov 0  }
   0x2   :  { %s3105_s17 = smov 0   ;;  %s3107_s18 = smov 0  }
   0x3 LB: > { %s3122_s19 = sadd.s32 4294967295, %s3063_s18   ;;  %s2434_s20 = sadd.s32 4294967294, %s3063_s18   ;;  %s3063_s18 = sphi %s3107_s18, %s4122_s18   ;;  %s3059_s17 = sphi %s3105_s17, %s4121_s17   ;;  %s3055_s16 = sphi %s3103_s16, %s4120_s16   ;;  %s3051_s15 = sphi %s3101_s15, %s4119_s15  }
   0x4   : > { %s3126_s21 = sadd.s32 1, %s3063_s18   ;;  %s118_s22 = sadd.s32 1, %s3059_s17 }
   0x5   : > { %s115_s23 = ssub.s32 %s3063_s18, %s3126_s21  ;;  %p128_p0 = scmp.ne.s32.totalorder %s3059_s17, %s3055_s16 }
   0x6   : > { %p116_p1 = scmp.eq.s32.totalorder %s115_s23, 0  ;;  %p129_p2 = scmp.eq.s32.totalorder %s3122_s19, 1 }
   0x7   : > { %p134_p3 = scmp.ne.s32.totalorder %s3055_s16, %s3051_s15  ;;  %p135_p4 = scmp.eq.s32.totalorder %s2434_s20, 1 }
   0x8   : > { %s3137_s24 = scalar_select %p116_p1, %s3059_s17, %s118_s22  }
   0x9   : > { %p3139_p5 = por %p129_p2, %p128_p0  ;;  %p3143_p6 = por %p135_p4, %p134_p3 }
   0xa   : > { %p2437_p7 = scmp.ge.s32.totalorder %s3063_s18, 1  ;;  %p175_p8 = scmp.lt.s32.totalorder %s3063_s18, 3 }
   0xc   : > { %p176_p9 = pnand %p2437_p7, %p175_p8 }
   0xe   : > { %179 = sbr.rel (%p176_p9) target bundleno = 667 (0x29b), region = 36 }
  0x15   : > { %p206_p10 = scmp.lt.s32.totalorder %s3122_s19, 1  ;;  %s3065_s6 = smov 16   ;;  %v2915_v59 = vld [vmem:[%s4096_s2] sm:$0xff]   ;;  %vm1083_vm0 = vcmask 64512   ;;  %vm1132_vm1 = vcmask 130048   ;;  %vm1165_vm2 = vcmask 195584  }
  0x16   : > { %s3066_s7 = smov 8   ;;  %2751 = vmatprep.subr.bf16.mxu0 %v2915_v59  ;;  %s3067_s10 = smov 24   ;;  %vm1198_vm3 = vcmask 261120   ;;  %vm1231_vm4 = vcmask 326656   ;;  %vm1328_vm5 = vcmask 392192   ;;  %vm2245_vm6 = vcmask 1041408  }
  0x17   : > { %s3151_s27 = scalar_select %p206_p10, %s3122_s19, 1  ;;  %2752 = vmatpush3.bf16.msra.mxu0 %v2915_v59  ;;  %vm2052_vm7 = vcmask 31744   ;;  %vm2093_vm8 = vcmask 97280   ;;  %vm2126_vm9 = vcmask 162816   ;;  %vm2159_vm10 = vcmask 228352  }
  0x18   : > { %s3068_s13 = smov 32   ;;  %s3069_s22 = smov 40   ;;  %vm2232_vm11 = vcmask 293888  }
  0x19   : > { %s2788_s28 = smul.u32 144, %s3151_s27  ;;  %s3071_s8 = smov 12  }
  0x1a   : > { %s2789_s23 = smul.u32 80, %s3151_s27  ;;  %s3070_s27 = smov 4  }
  0x1b   : > { %s3157_s5 = scalar_lea.vmem %s4094_s0, %s2788_s28  ;;  %s3072_s9 = smov 20  }
  0x1c   : > { %v2442_v0 = vld [vmem:[%s3157_s5 + $0x10] sm:$0xf]  ;;  %v2458_v1 = vld [vmem:[%s3157_s5 + $0x14] sm:$0x1]  ;;  %v2441_v2 = vld [vmem:[%s3157_s5 + $0x8] sm:$0xf]  ;;  %s3260_s30 = scalar_lea.vmem %s4095_s1, %s2789_s23 }
  0x1d   : > { %v2522_v3 = vcombine.low %v2442_v0, %v2442_v0  ;;  %v2457_v4 = vld [vmem:[%s3157_s5 + $0xc] sm:$0x1]  ;;  %v2521_v5 = vcombine.low %v2441_v2, %v2441_v2  ;;  %v2444_v6 = vld [vmem:[%s3157_s5 + $0x20] sm:$0xf]  ;;  %v2460_v7 = vld [vmem:[%s3157_s5 + $0x24] sm:$0x1]  ;;  %v2538_v10 = vcombine.low %v2442_v0, %v2458_v1 }
  0x1e   : > { %v2443_v8 = vld [vmem:[%s3157_s5 + $0x18] sm:$0xf]  ;;  %v3167_v9 = vld [vmem:[%s3157_s5 + $0x10] sm:$0xf]  ;;  %v2524_v11 = vcombine.low %v2444_v6, %v2444_v6  ;;  %v235_v13 = vld [vmem:[%s3157_s5 + $0x14] sm:$0x1]  ;;  %v2537_v19 = vcombine.low %v2441_v2, %v2457_v4  ;;  %v2540_v29 = vcombine.low %v2444_v6, %v2460_v7 }
  0x1f   : > { %589 = vrot.lane.b32.xlu1 %v2522_v3, %s3065_s6  ;;  %587 = vrot.lane.b32.xlu0 %v2521_v5, %s3065_s6  ;;  %v2523_v12 = vcombine.low %v2443_v8, %v2443_v8  ;;  %v3173_v14 = vld [vmem:[%s3157_s5] sm:$0xf]  ;;  %v2459_v15 = vld [vmem:[%s3157_s5 + $0x1c] sm:$0x1]  ;;  %v2507_v16 = vcombine.low %v3167_v9, %v235_v13  ;;  %v677_v28 = vshll.u32 %v2538_v10, 16  ;;  %v675_v44 = vshrl.u32 %v2538_v10, 16 }
  0x20   : > { %v233_v17 = vld [vmem:[%s3157_s5 + $0x4] sm:$0x1]  ;;  %v3179_v18 = vld [vmem:[%s3157_s5 + $0x18] sm:$0xf]  ;;  %v236_v21 = vld [vmem:[%s3157_s5 + $0x1c] sm:$0x1]  ;;  %v2539_v32 = vcombine.low %v2443_v8, %v2459_v15 }
  0x21   : > { %v2505_v20 = vcombine.low %v3173_v14, %v233_v17  ;;  %v3184_v22 = vld [vmem:[%s3157_s5 + $0x8] sm:$0xf]  ;;  %v234_v23 = vld [vmem:[%s3157_s5 + $0xc] sm:$0x1]  ;;  %v410_v24 = vshrl.u32 %v2507_v16, 16  ;;  %v412_v25 = vshll.u32 %v2507_v16, 16  ;;  %v2508_v26 = vcombine.low %v3179_v18, %v236_v21 }
  0x22   : > { %v2506_v27 = vcombine.low %v3184_v22, %v234_v23  ;;  %v670_v36 = vshll.u32 %v2537_v19, 16  ;;  %v679_v46 = vrot.slane %v677_v28, 1  ;;  %v691_v47 = vshll.u32 %v2540_v29, 16  ;;  %v2490_v58 = vld [vmem:[%s3157_s5 + $0x1c] sm:$0x1]  ;;  %v2916_v4 = vld [vmem:[%s4096_s2 + $0x8] sm:$0xff]  }
  0x23   : > { %593 = vrot.lane.b32.xlu1 %v2524_v11, %s3065_s6  ;;  %591 = vrot.lane.b32.xlu0 %v2523_v12, %s3065_s6  ;;  %v396_v30 = vshrl.u32 %v2505_v20, 16  ;;  %v398_v31 = vshll.u32 %v2505_v20, 16  ;;  %v414_v33 = vrot.slane %v412_v25, 1  ;;  %v417_v34 = vshrl.u32 %v2508_v26, 16  ;;  %v2489_v60 = vld [vmem:[%s3157_s5 + $0x14] sm:$0x1] }
  0x24   : > { %v419_v35 = vshll.u32 %v2508_v26, 16  ;;  %v403_v38 = vshrl.u32 %v2506_v27, 16  ;;  %v405_v39 = vshll.u32 %v2506_v27, 16  ;;  %v668_v48 = vshrl.u32 %v2537_v19, 16  ;;  %v2474_v61 = vld [vmem:[%s3157_s5 + $0x18] sm:$0xf]  ;;  %2753 = vmatprep.subr.bf16.mxu0 %v2916_v4 }
  0x25   : > { %v400_v37 = vrot.slane %v398_v31, 1  ;;  %v415_v40 = vor.u32 %v414_v33, %v410_v24  ;;  %v672_v50 = vrot.slane %v670_v36, 1  ;;  %v684_v51 = vshll.u32 %v2539_v32, 16  ;;  %v2473_v0 = vld [vmem:[%s3157_s5 + $0x10] sm:$0xf]  ;;  %2754 = vmatpush3.bf16.msra.mxu0 %v2916_v4  ;;  %s3073_s11 = smov 28  }
  0x26   : > { %v421_v41 = vrot.slane %v419_v35, 1  ;;  %v407_v43 = vrot.slane %v405_v39, 1  ;;  %v680_v52 = vor.u32 %v679_v46, %v675_v44  ;;  %v689_v53 = vshrl.u32 %v2540_v29, 16  ;;  %v2492_v3 = vld [vmem:[%s3157_s5 + $0x2c] sm:$0x1]  ;;  %v2921_v36 = vld [vmem:[%s4096_s2 + $0x10] sm:$0xff]  }
  0x27   : > { %v401_v42 = vor.u32 %v400_v37, %v396_v30  ;;  %511 = vrot.lane.b32.xlu1 %v415_v40, %s3066_s7  ;;  %v693_v54 = vrot.slane %v691_v47, 1  ;;  %v673_v55 = vor.u32 %v672_v50, %v668_v48  ;;  %v682_v56 = vshrl.u32 %v2539_v32, 16  ;;  %v2491_v5 = vld [vmem:[%s3157_s5 + $0x24] sm:$0x1]  ;;  %v2476_v6 = vld [vmem:[%s3157_s5 + $0x28] sm:$0xf]  ;;  %2755 = vmatprep.subr.bf16.mxu0 %v2921_v36 }
  0x28   : > { %v422_v45 = vor.u32 %v421_v41, %v417_v34  ;;  %v408_v49 = vor.u32 %v407_v43, %v403_v38  ;;  %v686_v57 = vrot.slane %v684_v51, 1  ;;  %v2570_v63 = vcombine.low %v2474_v61, %v2490_v58  ;;  %v2475_v10 = vld [vmem:[%s3157_s5 + $0x20] sm:$0xf]  ;;  %v222_v16 = vld [vmem:[%s3157_s5 + $0x28] sm:$0xf] }
  0x29   : > { %507 = vrot.lane.b32.xlu0 %v401_v42, %s3066_s7  ;;  %v694_v62 = vor.u32 %v693_v54, %v689_v53  ;;  %v2569_v2 = vcombine.low %v2473_v0, %v2489_v60  ;;  %v2554_v7 = vcombine.low %v2474_v61, %v2474_v61  ;;  %v2572_v8 = vcombine.low %v2476_v6, %v2492_v3  ;;  %v238_v17 = vld [vmem:[%s3157_s5 + $0x2c] sm:$0x1]  ;;  %v221_v19 = vld [vmem:[%s3157_s5 + $0x20] sm:$0xf]  ;;  %v237_v20 = vld [vmem:[%s3157_s5 + $0x24] sm:$0x1] }
  0x2a   : > { %v687_v1 = vor.u32 %v686_v57, %v682_v56  ;;  %v949_v11 = vshll.u32 %v2570_v63, 16  ;;  %v2553_v12 = vcombine.low %v2473_v0, %v2473_v0  ;;  %v2571_v13 = vcombine.low %v2475_v10, %v2491_v5  ;;  %v224_v28 = vld [vmem:[%s3157_s5 + $0x38] sm:$0xf]  ;;  %v240_v33 = vld [vmem:[%s3157_s5 + $0x3c] sm:$0x1]  ;;  %2756 = vmatpush3.bf16.msra.mxu0 %v2921_v36 }
  0x2b   : > { %513 = vrot.lane.b32.xlu1 %v422_v45, %s3066_s7  ;;  %v942_v15 = vshll.u32 %v2569_v2, 16  ;;  %v2556_v21 = vcombine.low %v2476_v6, %v2476_v6  ;;  %v2555_v23 = vcombine.low %v2475_v10, %v2475_v10  ;;  %v947_v24 = vshrl.u32 %v2570_v63, 16  ;;  %v223_v34 = vld [vmem:[%s3157_s5 + $0x30] sm:$0xf]  ;;  %v239_v35 = vld [vmem:[%s3157_s5 + $0x34] sm:$0x1] }
  0x2c   : > { %v951_v25 = vrot.slane %v949_v11, 1  ;;  %v963_v26 = vshll.u32 %v2572_v8, 16  ;;  %v2510_v27 = vcombine.low %v222_v16, %v238_v17  ;;  %v940_v29 = vshrl.u32 %v2569_v2, 16  ;;  %v2462_v61 = vld [vmem:[%s3157_s5 + $0x34] sm:$0x1] }
  0x2d   : > { %509 = vrot.lane.b32.xlu0 %v408_v49, %s3066_s7  ;;  %v944_v30 = vrot.slane %v942_v15, 1  ;;  %v956_v31 = vshll.u32 %v2571_v13, 16  ;;  %v2509_v32 = vcombine.low %v221_v19, %v237_v20  ;;  %v961_v37 = vshrl.u32 %v2572_v8, 16  ;;  %v2446_v63 = vld [vmem:[%s3157_s5 + $0x30] sm:$0xf] }
  0x2e   : > { %v954_v38 = vshrl.u32 %v2571_v13, 16  ;;  %v952_v39 = vor.u32 %v951_v25, %v947_v24  ;;  %v965_v40 = vrot.slane %v963_v26, 1  ;;  %v433_v41 = vshll.u32 %v2510_v27, 16  ;;  %v2445_v2 = vld [vmem:[%s3157_s5 + $0x28] sm:$0xf] }
  0x2f   : > { %781 = vrot.lane.b32.xlu1 %v680_v52, %s3067_s10  ;;  %v2512_v42 = vcombine.low %v224_v28, %v240_v33  ;;  %v945_v43 = vor.u32 %v944_v30, %v940_v29  ;;  %v958_v44 = vrot.slane %v956_v31, 1  ;;  %v426_v45 = vshll.u32 %v2509_v32, 16  ;;  %v2464_v5 = vld [vmem:[%s3157_s5 + $0x44] sm:$0x1]  ;;  %v2463_v6 = vld [vmem:[%s3157_s5 + $0x3c] sm:$0x1] }
  0x30   : > { %v2511_v46 = vcombine.low %v223_v34, %v239_v35  ;;  %v966_v47 = vor.u32 %v965_v40, %v961_v37  ;;  %v431_v48 = vshrl.u32 %v2510_v27, 16  ;;  %v435_v49 = vrot.slane %v433_v41, 1  ;;  %v2447_v11 = vld [vmem:[%s3157_s5 + $0x38] sm:$0xf]  ;;  %v2494_v33 = vld [vmem:[%s3157_s5 + $0x3c] sm:$0x1] }
  0x31   : > { %779 = vrot.lane.b32.xlu0 %v673_v55, %s3067_s10  ;;  %v447_v50 = vshll.u32 %v2512_v42, 16  ;;  %v959_v51 = vor.u32 %v958_v44, %v954_v38  ;;  %v424_v52 = vshrl.u32 %v2509_v32, 16  ;;  %v428_v53 = vrot.slane %v426_v45, 1  ;;  %v2493_v34 = vld [vmem:[%s3157_s5 + $0x34] sm:$0x1] }
  0x32   : > { %v440_v54 = vshll.u32 %v2511_v46, 16  ;;  %v436_v55 = vor.u32 %v435_v49, %v431_v48  ;;  %v445_v56 = vshrl.u32 %v2512_v42, 16  ;;  %v438_v59 = vshrl.u32 %v2511_v46, 16  ;;  %v2478_v35 = vld [vmem:[%s3157_s5 + $0x38] sm:$0xf] }
  0x33   : > { %785 = vrot.lane.b32.xlu1 %v694_v62, %s3067_s10  ;;  %v449_v57 = vrot.slane %v447_v50, 1  ;;  %v429_v58 = vor.u32 %v428_v53, %v424_v52  ;;  %v2461_v62 = vld [vmem:[%s3157_s5 + $0x2c] sm:$0x1]  ;;  %v2526_v8 = vcombine.low %v2446_v63, %v2446_v63  ;;  %v2525_v13 = vcombine.low %v2445_v2, %v2445_v2  ;;  %v2477_v38 = vld [vmem:[%s3157_s5 + $0x30] sm:$0xf] }
  0x34   : > { %v442_v60 = vrot.slane %v440_v54, 1  ;;  %v2541_v4 = vcombine.low %v2445_v2, %v2461_v62  ;;  %v2543_v15 = vcombine.low %v2447_v11, %v2463_v6  ;;  %v2574_v37 = vcombine.low %v2478_v35, %v2494_v33  ;;  %v2496_v41 = vld [vmem:[%s3157_s5 + $0x4c] sm:$0x1]  ;;  %v2495_v42 = vld [vmem:[%s3157_s5 + $0x44] sm:$0x1] }
  0x35   : > { %783 = vrot.lane.b32.xlu0 %v687_v1, %s3067_s10  ;;  %v450_v0 = vor.u32 %v449_v57, %v445_v56  ;;  %v2542_v1 = vcombine.low %v2446_v63, %v2462_v61  ;;  %v2573_v40 = vcombine.low %v2477_v38, %v2493_v34  ;;  %v2558_v44 = vcombine.low %v2478_v35, %v2478_v35  ;;  %v2479_v46 = vld [vmem:[%s3157_s5 + $0x40] sm:$0xf]  ;;  %v3268_v52 = vld [vmem:[%s3260_s30 + $0xc] sm:$0x1]  ;;  %v3272_v54 = vld [vmem:[%s3260_s30 + $0x4] sm:$0x1] }
  0x36   : > { %v443_v3 = vor.u32 %v442_v60, %v438_v59  ;;  %v698_v16 = vshll.u32 %v2541_v4, 16  ;;  %v696_v24 = vshrl.u32 %v2541_v4, 16  ;;  %v712_v26 = vshll.u32 %v2543_v15, 16  ;;  %v1450_v53 = vld [vmem:[%s3260_s30] sm:$0xf] }
  0x37   : > { %861 = vrot.lane.b32.xlu1 %v2554_v7, %s3068_s13  ;;  %v2448_v7 = vld [vmem:[%s3157_s5 + $0x40] sm:$0xf]  ;;  %v703_v19 = vshrl.u32 %v2542_v1, 16  ;;  %v710_v31 = vshrl.u32 %v2543_v15, 16  ;;  %v2557_v48 = vcombine.low %v2477_v38, %v2477_v38  ;;  %v2575_v49 = vcombine.low %v2479_v46, %v2495_v42  ;;  %v1453_v61 = vld [vmem:[%s3260_s30 + $0x18] sm:$0xf] }
  0x38   : > { %v2544_v10 = vcombine.low %v2448_v7, %v2464_v5  ;;  %v2528_v17 = vcombine.low %v2448_v7, %v2448_v7  ;;  %v700_v25 = vrot.slane %v698_v16, 1  ;;  %v714_v32 = vrot.slane %v712_v26, 1  ;;  %v1461_v2 = vld [vmem:[%s3260_s30 + $0x1c] sm:$0x1]  ;;  %v1460_v4 = vld [vmem:[%s3260_s30 + $0x14] sm:$0x1] }
  0x39   : > { %859 = vrot.lane.b32.xlu0 %v2553_v12, %s3068_s13  ;;  %v705_v12 = vshll.u32 %v2542_v1, 16  ;;  %v970_v50 = vshll.u32 %v2573_v40, 16  ;;  %v2559_v56 = vcombine.low %v2479_v46, %v2479_v46  ;;  %v975_v57 = vshrl.u32 %v2574_v37, 16  ;;  %v1467_v33 = vld [vmem:[%s3260_s30 + $0x8] sm:$0xe] }
  0x3a   : > { %v717_v28 = vshrl.u32 %v2544_v10, 16  ;;  %v701_v30 = vor.u32 %v700_v25, %v696_v24  ;;  %v968_v62 = vshrl.u32 %v2573_v40, 16  ;;  %v2652_v1 = vcombine.low %v1450_v53, %v3272_v54  ;;  %v1466_v34 = vld [vmem:[%s3260_s30] sm:$0xe]  ;;  %v226_v40 = vld [vmem:[%s3157_s5 + $0x48] sm:$0xf] }
  0x3b   : > { %865 = vrot.lane.b32.xlu1 %v2556_v21, %s3068_s13  ;;  %v707_v20 = vrot.slane %v705_v12, 1  ;;  %v719_v21 = vshll.u32 %v2544_v10, 16  ;;  %v972_v63 = vrot.slane %v970_v50, 1  ;;  %v982_v6 = vshrl.u32 %v2575_v49, 16  ;;  %v1468_v42 = vld [vmem:[%s3260_s30 + $0x10] sm:$0xe] }
  0x3c   : > { %v1567_v15 = vshll.u32 %v2652_v1, 16  ;;  %v1565_v24 = vshrl.u32 %v2652_v1, 16  ;;  %v2660_v38 = vcombine.low %v1466_v34, %v3272_v54  ;;  %v2605_v54 = vld [vmem:[%s3260_s30 + $0x10] sm:$0xf] }
  0x3d   : > { %863 = vrot.lane.b32.xlu0 %v2555_v23, %s3068_s13  ;;  %v2527_v23 = vcombine.low %v2447_v11, %v2447_v11  ;;  %v708_v27 = vor.u32 %v707_v20, %v703_v19  ;;  %v721_v29 = vrot.slane %v719_v21, 1  ;;  %v2655_v11 = vcombine.low %v1453_v61, %v1461_v2 }
  0x3e   : > { %v973_v12 = vor.u32 %v972_v63, %v968_v62  ;;  %v1569_v25 = vrot.slane %v1567_v15, 1 }
  0x3f   : > { %1053 = vrot.lane.b32.xlu1 %v952_v39, %s3069_s22  ;;  %v722_v36 = vor.u32 %v721_v29, %v717_v28  ;;  %v715_v39 = vor.u32 %v714_v32, %v710_v31  ;;  %v1588_v21 = vshll.u32 %v2655_v11, 16  ;;  %v1586_v28 = vshrl.u32 %v2655_v11, 16 }
  0x41   : > { %1051 = vrot.lane.b32.xlu0 %v945_v43, %s3069_s22  ;;  %v2480_v43 = vld [vmem:[%s3157_s5 + $0x48] sm:$0xf]  ;;  %v1590_v29 = vrot.slane %v1588_v21, 1 }
  0x42   : > { %v2576_v45 = vcombine.low %v2480_v43, %v2496_v41  ;;  %v242_v41 = vld [vmem:[%s3157_s5 + $0x4c] sm:$0x1] }
  0x43   : > { %1057 = vrot.lane.b32.xlu1 %v966_v47, %s3069_s22  ;;  %v977_v47 = vshll.u32 %v2574_v37, 16  ;;  %v1591_v35 = vor.u32 %v1590_v29, %v1586_v28  ;;  %v3330_v28 = vld [vmem:[%s3260_s30 + $0x1c] sm:$0x1] }
  0x44   : > { %v991_v59 = vshll.u32 %v2576_v45, 16  ;;  %v989_v5 = vshrl.u32 %v2576_v45, 16 }
  0x45   : > { %1055 = vrot.lane.b32.xlu0 %v959_v51, %s3069_s22  ;;  %v1451_v51 = vld [vmem:[%s3260_s30 + $0x8] sm:$0xf] }
  0x46   : > { %v2653_v60 = vcombine.low %v1451_v51, %v3268_v52 }
  0x47   : > { %517 = vrot.lane.b32.xlu1 %v436_v55, %s3066_s7  ;;  %v2560_v55 = vcombine.low %v2480_v43, %v2480_v43  ;;  %v225_v43 = vld [vmem:[%s3157_s5 + $0x40] sm:$0xf] }
  0x48   : > { %v1574_v10 = vshll.u32 %v2653_v60, 16  ;;  %v1572_v19 = vshrl.u32 %v2653_v60, 16 }
  0x49   : > { %515 = vrot.lane.b32.xlu0 %v429_v58, %s3066_s7  ;;  %v979_v58 = vrot.slane %v977_v47, 1  ;;  %v2514_v47 = vcombine.low %v226_v40, %v242_v41  ;;  %v2450_v40 = vld [vmem:[%s3157_s5 + $0x50] sm:$0xf] }
  0x4a   : > { %v1576_v20 = vrot.slane %v1574_v10, 1 }
  0x4b   : > { %521 = vrot.lane.b32.xlu1 %v450_v0, %s3066_s7  ;;  %v984_v0 = vshll.u32 %v2575_v49, 16  ;;  %v980_v7 = vor.u32 %v979_v58, %v975_v57  ;;  %v2662_v49 = vcombine.low %v1468_v42, %v1460_v4  ;;  %v2604_v57 = vld [vmem:[%s3260_s30 + $0x8] sm:$0xf]  ;;  %v3310_v58 = vld [vmem:[%s3260_s30 + $0xc] sm:$0x1]  ;;  %v459_v61 = vshrl.u32 %v2514_v47, 16 }
  0x4c   : > { %v2668_v63 = vcombine.low %v2604_v57, %v2604_v57  ;;  %v2449_v42 = vld [vmem:[%s3157_s5 + $0x48] sm:$0xf] }
  0x4d   : > { %519 = vrot.lane.b32.xlu0 %v443_v3, %s3066_s7  ;;  %v1452_v3 = vld [vmem:[%s3260_s30 + $0x10] sm:$0xf]  ;;  %v1662_v53 = vrot.slane %v2662_v49, 1  ;;  %v2529_v49 = vcombine.low %v2449_v42, %v2449_v42 }
  0x4e   : > { %v2654_v16 = vcombine.low %v1452_v3, %v1460_v4  ;;  %v228_v3 = vld [vmem:[%s3157_s5 + $0x58] sm:$0xf]  ;;  %v244_v4 = vld [vmem:[%s3157_s5 + $0x5c] sm:$0x1] }
  0x4f   : > { %597 = vrot.lane.b32.xlu1 %v2526_v8, %s3065_s6  ;;  %v993_v8 = vrot.slane %v991_v59, 1  ;;  %v2669_v59 = vcombine.low %v2605_v54, %v2605_v54  ;;  %v2516_v10 = vcombine.low %v228_v3, %v244_v4 }
  0x50   : > { %v1581_v26 = vshll.u32 %v2654_v16, 16  ;;  %v1579_v31 = vshrl.u32 %v2654_v16, 16  ;;  %v2606_v16 = vld [vmem:[%s3260_s30 + $0x18] sm:$0xf] }
  0x51   : > { %595 = vrot.lane.b32.xlu0 %v2525_v13, %s3065_s6  ;;  %v986_v13 = vrot.slane %v984_v0, 1  ;;  %v2676_v0 = vcombine.low %v2604_v57, %v3310_v58  ;;  %v475_v21 = vshll.u32 %v2516_v10, 16 }
  0x52   : > { %v1583_v32 = vrot.slane %v1581_v26, 1 }
  0x53   : > { %601 = vrot.lane.b32.xlu1 %v2528_v17, %s3065_s6  ;;  %v994_v17 = vor.u32 %v993_v8, %v989_v5  ;;  %v227_v5 = vld [vmem:[%s3157_s5 + $0x50] sm:$0xf] }
  0x54   : > { %v1584_v37 = vor.u32 %v1583_v32, %v1579_v31  ;;  %v473_v31 = vshrl.u32 %v2516_v10, 16  ;;  %v477_v32 = vrot.slane %v475_v21, 1 }
  0x55   : > { %599 = vrot.lane.b32.xlu0 %v2527_v23, %s3065_s6  ;;  %v987_v23 = vor.u32 %v986_v13, %v982_v6  ;;  %v243_v6 = vld [vmem:[%s3157_s5 + $0x54] sm:$0x1]  ;;  %v1751_v13 = vshll.u32 %v2676_v0, 16 }
  0x56   : > { %v2515_v15 = vcombine.low %v227_v5, %v243_v6  ;;  %v2451_v6 = vld [vmem:[%s3157_s5 + $0x58] sm:$0xf] }
  0x57   : > { %789 = vrot.lane.b32.xlu1 %v708_v27, %s3067_s10  ;;  %v1577_v27 = vor.u32 %v1576_v20, %v1572_v19  ;;  %v1753_v26 = vrot.slane %v1751_v13, 1 }
  0x59   : > { %787 = vrot.lane.b32.xlu0 %v701_v30, %s3067_s10  ;;  %v1570_v30 = vor.u32 %v1569_v25, %v1565_v24  ;;  %v2670_v24 = vcombine.low %v2606_v16, %v2606_v16  ;;  %v1749_v25 = vshrl.u32 %v2676_v0, 16 }
  0x5b   : > { %793 = vrot.lane.b32.xlu1 %v722_v36, %s3067_s10  ;;  %v2661_v36 = vcombine.low %v1467_v33, %v3268_v52  ;;  %v461_v52 = vshll.u32 %v2514_v47, 16  ;;  %v2678_v33 = vcombine.low %v2606_v16, %v3330_v28  ;;  %v1754_v34 = vor.u32 %v1753_v26, %v1749_v25  ;;  %v2623_v16 = vld [vmem:[%s3260_s30 + $0x20] sm:$0xe] }
  0x5d   : > { %791 = vrot.lane.b32.xlu0 %v715_v39, %s3067_s10  ;;  %v1469_v39 = vld [vmem:[%s3260_s30 + $0x18] sm:$0xe]  ;;  %v1661_v45 = vrot.slane %v2661_v36, 1  ;;  %v463_v62 = vrot.slane %v461_v52, 1  ;;  %v1765_v41 = vshll.u32 %v2678_v33, 16 }
  0x5e   : > { %v2663_v46 = vcombine.low %v1469_v39, %v1461_v2  ;;  %v2621_v52 = vld [vmem:[%s3260_s30 + $0x10] sm:$0xe] }
  0x5f   : > { %869 = vrot.lane.b32.xlu1 %v2558_v44, %s3068_s13  ;;  %v241_v44 = vld [vmem:[%s3157_s5 + $0x44] sm:$0x1] }
  0x60   : > { %v2513_v50 = vcombine.low %v225_v43, %v241_v44  ;;  %v1663_v51 = vrot.slane %v2663_v46, 1  ;;  %v2530_v43 = vcombine.low %v2450_v40, %v2450_v40 }
  0x61   : > { %867 = vrot.lane.b32.xlu0 %v2557_v48, %s3068_s13  ;;  %v1660_v48 = vrot.slane %v2660_v38, 1 }
  0x62   : > { %v452_v1 = vshrl.u32 %v2513_v50, 16 }
  0x63   : > { %873 = vrot.lane.b32.xlu1 %v2560_v55, %s3068_s13  ;;  %v3306_v55 = vld [vmem:[%s3260_s30 + $0x14] sm:$0x1] }
  0x64   : > { %v2677_v60 = vcombine.low %v2605_v54, %v3306_v55  ;;  %v2620_v54 = vld [vmem:[%s3260_s30 + $0x8] sm:$0xe] }
  0x65   : > { %871 = vrot.lane.b32.xlu0 %v2559_v56, %s3068_s13  ;;  %v454_v56 = vshll.u32 %v2513_v50, 16  ;;  %v1763_v50 = vshrl.u32 %v2678_v33, 16  ;;  %v2684_v0 = vcombine.low %v2620_v54, %v3310_v58  ;;  %v2498_v54 = vld [vmem:[%s3157_s5 + $0x5c] sm:$0x1] }
  0x66   : > { %v1758_v8 = vshll.u32 %v2677_v60, 16  ;;  %v1756_v19 = vshrl.u32 %v2677_v60, 16 }
  0x67   : > { %1061 = vrot.lane.b32.xlu1 %v980_v7, %s3069_s22  ;;  %v456_v2 = vrot.slane %v454_v56, 1  ;;  %v464_v7 = vor.u32 %v463_v62, %v459_v61  ;;  %v1844_v3 = vrot.slane %v2684_v0, 1 }
  0x68   : > { %v1760_v20 = vrot.slane %v1758_v8, 1 }
  0x69   : > { %1059 = vrot.lane.b32.xlu0 %v973_v12, %s3069_s22  ;;  %v457_v11 = vor.u32 %v456_v2, %v452_v1  ;;  %v2607_v12 = vld [vmem:[%s3260_s30 + $0x20] sm:$0xf] }
  0x6b   : > { %1065 = vrot.lane.b32.xlu1 %v994_v17, %s3069_s22  ;;  %v2671_v17 = vcombine.low %v2607_v12, %v2607_v12 }
  0x6d   : > { %1063 = vrot.lane.b32.xlu0 %v987_v23, %s3069_s22  ;;  %v3327_v23 = vld [vmem:[%s3260_s30 + $0x24] sm:$0x1] }
  0x6e   : > { %v2679_v29 = vcombine.low %v2607_v12, %v3327_v23  ;;  %v2531_v12 = vcombine.low %v2451_v6, %v2451_v6  ;;  %v2687_v26 = vcombine.low %v2623_v16, %v3327_v23 }
  0x6f   : > { %1622 = vrot.lane.b32.xlu1 %v1577_v27, %s3070_s27  ;;  %v468_v27 = vshll.u32 %v2515_v15, 16 }
  0x70   : > { %v1772_v38 = vshll.u32 %v2679_v29, 16  ;;  %v1770_v44 = vshrl.u32 %v2679_v29, 16  ;;  %v1847_v33 = vrot.slane %v2687_v26, 1 }
  0x71   : > { %1620 = vrot.lane.b32.xlu0 %v1570_v30, %s3070_s27  ;;  %v1761_v30 = vor.u32 %v1760_v20, %v1756_v19  ;;  %v470_v36 = vrot.slane %v468_v27, 1  ;;  %v2467_v19 = vld [vmem:[%s3157_s5 + $0x5c] sm:$0x1]  ;;  %v2622_v20 = vld [vmem:[%s3260_s30 + $0x18] sm:$0xe] }
  0x72   : > { %v2547_v27 = vcombine.low %v2451_v6, %v2467_v19 }
  0x73   : > { %1626 = vrot.lane.b32.xlu1 %v1591_v35, %s3070_s27  ;;  %v466_v35 = vshrl.u32 %v2515_v15, 16 }
  0x75   : > { %1624 = vrot.lane.b32.xlu0 %v1584_v37, %s3070_s27  ;;  %v478_v37 = vor.u32 %v477_v32, %v473_v31  ;;  %v471_v39 = vor.u32 %v470_v36, %v466_v35  ;;  %v2629_v36 = vld [vmem:[%s3260_s30 + $0x18] sm:$0xf] }
  0x77   : > { %1670 = vrot.lane.b32.xlu1 %v1661_v45, %s3066_s7  ;;  %v1774_v45 = vrot.slane %v1772_v38, 1  ;;  %v2628_v38 = vld [vmem:[%s3260_s30 + $0x10] sm:$0xf] }
  0x79   : > { %1668 = vrot.lane.b32.xlu0 %v1660_v48, %s3066_s7  ;;  %v2466_v48 = vld [vmem:[%s3157_s5 + $0x54] sm:$0x1]  ;;  %v1775_v57 = vor.u32 %v1774_v45, %v1770_v44  ;;  %v738_v44 = vshrl.u32 %v2547_v27, 16 }
  0x7a   : > { %v2546_v56 = vcombine.low %v2450_v40, %v2466_v48 }
  0x7b   : > { %1674 = vrot.lane.b32.xlu1 %v1663_v51, %s3066_s7  ;;  %v1767_v51 = vrot.slane %v1765_v41, 1 }
  0x7c   : > { %v733_v2 = vshll.u32 %v2546_v56, 16  ;;  %v731_v8 = vshrl.u32 %v2546_v56, 16  ;;  %v2481_v56 = vld [vmem:[%s3157_s5 + $0x50] sm:$0xf] }
  0x7d   : > { %1672 = vrot.lane.b32.xlu0 %v1662_v53, %s3066_s7  ;;  %v2465_v53 = vld [vmem:[%s3157_s5 + $0x4c] sm:$0x1] }
  0x7e   : > { %v2545_v60 = vcombine.low %v2449_v42, %v2465_v53  ;;  %v735_v10 = vrot.slane %v733_v2, 1  ;;  %v3387_v42 = vld [vmem:[%s3260_s30 + $0x1c] sm:$0x1]  ;;  %v2482_v53 = vld [vmem:[%s3157_s5 + $0x58] sm:$0xf] }
  0x7f   : > { %1710 = vrot.lane.b32.xlu1 %v2669_v59, %s3071_s8  ;;  %v2685_v59 = vcombine.low %v2621_v52, %v3306_v55  ;;  %v2452_v55 = vld [vmem:[%s3157_s5 + $0x60] sm:$0xf] }
  0x80   : > { %v726_v4 = vshll.u32 %v2545_v60, 16  ;;  %v2532_v58 = vcombine.low %v2452_v55, %v2452_v55  ;;  %v724_v13 = vshrl.u32 %v2545_v60, 16  ;;  %v736_v25 = vor.u32 %v735_v10, %v731_v8 }
  0x81   : > { %1708 = vrot.lane.b32.xlu0 %v2668_v63, %s3071_s8  ;;  %v1768_v63 = vor.u32 %v1767_v51, %v1763_v50  ;;  %v1845_v1 = vrot.slane %v2685_v59, 1  ;;  %v3393_v51 = vcombine.low %v2629_v36, %v3387_v42 }
  0x82   : > { %v728_v15 = vrot.slane %v726_v4, 1  ;;  %v2631_v4 = vld [vmem:[%s3260_s30 + $0x28] sm:$0xf] }
  0x83   : > { %525 = vrot.lane.b32.xlu1 %v464_v7, %s3066_s7 }
  0x84   : > { %v729_v29 = vor.u32 %v728_v15, %v724_v13 }
  0x85   : > { %523 = vrot.lane.b32.xlu0 %v457_v11, %s3066_s7  ;;  %v2468_v11 = vld [vmem:[%s3157_s5 + $0x64] sm:$0x1] }
  0x87   : > { %1714 = vrot.lane.b32.xlu1 %v2671_v17, %s3071_s8 }
  0x89   : > { %1712 = vrot.lane.b32.xlu0 %v2670_v24, %s3071_s8  ;;  %v2548_v24 = vcombine.low %v2452_v55, %v2468_v11  ;;  %v3408_v55 = vcombine.low %v2482_v53, %v2498_v54 }
  0x8b   : > { %1806 = vrot.lane.b32.xlu1 %v1761_v30, %s3065_s6  ;;  %v2686_v30 = vcombine.low %v2622_v20, %v3330_v28  ;;  %v2693_v28 = vcombine.low %v2629_v36, %v2629_v36  ;;  %v745_v40 = vshrl.u32 %v2548_v24, 16 }
  0x8d   : > { %1804 = vrot.lane.b32.xlu0 %v1754_v34, %s3065_s6  ;;  %v747_v34 = vshll.u32 %v2548_v24, 16  ;;  %v1846_v35 = vrot.slane %v2686_v30, 1  ;;  %v3445_v30 = vld [vmem:[%s3260_s30 + $0x2c] sm:$0x1] }
  0x8f   : > { %529 = vrot.lane.b32.xlu1 %v478_v37, %s3066_s7  ;;  %v740_v37 = vshll.u32 %v2547_v27, 16  ;;  %v749_v41 = vrot.slane %v747_v34, 1  ;;  %v3451_v34 = vld [vmem:[%s3260_s30 + $0x24] sm:$0x1] }
  0x91   : > { %527 = vrot.lane.b32.xlu0 %v471_v39, %s3066_s7  ;;  %v3342_v46 = vpop.permute.xlu1 %589  ;;  %v3344_v47 = vpop.permute.xlu0 %587  ;;  %v742_v45 = vrot.slane %v740_v37, 1  ;;  %v750_v52 = vor.u32 %v749_v41, %v745_v40 }
  0x93   : > { %605 = vrot.lane.b32.xlu1 %v2530_v43, %s3065_s6  ;;  %v2692_v43 = vcombine.low %v2628_v38, %v2628_v38  ;;  %v743_v60 = vor.u32 %v742_v45, %v738_v44 }
  0x95   : > { %603 = vrot.lane.b32.xlu0 %v2529_v49, %s3065_s6  ;;  %v3353_v61 = vpop.permute.xlu1 %593  ;;  %v3355_v62 = vpop.permute.xlu0 %591  ;;  %v3390_v49 = vld [vmem:[%s3260_s30 + $0x14] sm:$0x1] }
  0x96   : > { %v3402_v59 = vcombine.low %v2628_v38, %v3390_v49 }
  0x97   : > { %1810 = vrot.lane.b32.xlu1 %v1775_v57, %s3065_s6 }
  0x99   : > { %1808 = vrot.lane.b32.xlu0 %v1768_v63, %s3065_s6  ;;  %v3361_v5 = vpop.permute.xlu1 %511  ;;  %v2497_v63 = vld [vmem:[%s3157_s5 + $0x54] sm:$0x1] }
  0x9b   : > { %v508_v7 = vpop.permute.xlu0 %507  ;;  %1854 = vrot.lane.b32.xlu1 %v1845_v1, %s3072_s9 }
  0x9c   : > { %v1086_v0 = vsel %vm1083_vm0, %v3173_v14, %v508_v7  ;;  %v2630_v14 = vld [vmem:[%s3260_s30 + $0x20] sm:$0xf]  ;;  %v1942_v7 = vshll.u32 %v3393_v51, 16 }
  0x9d   : > { %1852 = vrot.lane.b32.xlu0 %v1844_v3, %s3072_s9  ;;  %v3368_v17 = vpop.permute.xlu1 %513  ;;  %v2562_v3 = vcombine.low %v2482_v53, %v2482_v53  ;;  %v1134_v11 = vsel %vm1132_vm1, %v1086_v0, %v3344_v47  ;;  %v2694_v20 = vcombine.low %v2630_v14, %v2630_v14  ;;  %v2702_v40 = vcombine.low %v2630_v14, %v3451_v34 }
  0x9e   : > { %v1095_v8 = vsel %vm1083_vm0, %v3179_v18, %v3368_v17  ;;  %v2695_v18 = vcombine.low %v2631_v4, %v2631_v4 }
  0x9f   : > { %v510_v21 = vpop.permute.xlu0 %509  ;;  %609 = vrot.lane.b32.xlu1 %v2532_v58, %s3065_s6  ;;  %v3414_v58 = vcombine.low %v2481_v56, %v2497_v63  ;;  %v1140_v24 = vsel %vm1132_vm1, %v1095_v8, %v3353_v61  ;;  %v1949_v63 = vshll.u32 %v2702_v40, 16  ;;  %v1947_v8 = vshrl.u32 %v2702_v40, 16 }
  0xa0   : > { %v1089_v57 = vsel %vm1083_vm0, %v3184_v22, %v510_v21  ;;  %v2561_v22 = vcombine.low %v2481_v56, %v2481_v56  ;;  %v1940_v21 = vshrl.u32 %v3393_v51, 16  ;;  %v2500_v56 = vld [vmem:[%s3157_s5 + $0x6c] sm:$0x1] }
  0xa1   : > { %607 = vrot.lane.b32.xlu0 %v2531_v12, %s3065_s6  ;;  %v782_v31 = vpop.permute.xlu1 %781  ;;  %v1136_v6 = vsel %vm1132_vm1, %v1089_v57, %v3342_v46  ;;  %v1935_v46 = vshll.u32 %v3402_v59, 16  ;;  %v1092_v12 = vsel %vm1083_vm0, %v3167_v9, %v3361_v5  ;;  %v1944_v5 = vrot.slane %v1942_v7, 1 }
  0xa2   : > { %v1169_v10 = vsel %vm1165_vm2, %v1136_v6, %v782_v31  ;;  %v1138_v27 = vsel %vm1132_vm1, %v1092_v12, %v3355_v62  ;;  %v998_v44 = vshll.u32 %v3414_v58, 16  ;;  %v2645_v6 = vld [vmem:[%s3260_s30 + $0x18] sm:$0xe] }
  0xa3   : > { %v780_v32 = vpop.permute.xlu0 %779  ;;  %797 = vrot.lane.b32.xlu1 %v736_v25, %s3067_s10  ;;  %v1933_v25 = vshrl.u32 %v3402_v59, 16  ;;  %v1937_v31 = vrot.slane %v1935_v46, 1  ;;  %v1945_v38 = vor.u32 %v1944_v5, %v1940_v21  ;;  %v996_v59 = vshrl.u32 %v3414_v58, 16  ;;  %v2986_v58 = vld [vmem:[%s4097_s3] sm:$0xff]   ;;  %v3490_v46 = vld [vmem:[%s3260_s30 + $0x2c] sm:$0x1] }
  0xa4   : > { %v1167_v13 = vsel %vm1165_vm2, %v1134_v11, %v780_v32  ;;  %v3487_v11 = vld [vmem:[%s3260_s30 + $0x28] sm:$0xf]  ;;  %2773 = vmatprep.subr.bf16.mxu1 %v2986_v58 }
  0xa5   : > { %795 = vrot.lane.b32.xlu0 %v729_v29, %s3067_s10  ;;  %v3379_v23 = vpop.permute.xlu1 %785  ;;  %v1938_v41 = vor.u32 %v1937_v31, %v1933_v25  ;;  %2774 = vmatpush3.bf16.msra.mxu1 %v2986_v58  ;;  %v3519_v31 = vld [vmem:[%s3260_s30 + $0x38] sm:$0xf] }
  0xa6   : > { %v1173_v26 = vsel %vm1165_vm2, %v1140_v24, %v3379_v23  ;;  %v2703_v23 = vcombine.low %v2631_v4, %v3445_v30  ;;  %4107 = vst [vmem:[#allocation5_spill] sm:$0xff] %v3519_v31 }
  0xa7   : > { %v3382_v39 = vpop.permute.xlu0 %783  ;;  %1858 = vrot.lane.b32.xlu1 %v1847_v33, %s3072_s9 }
  0xa8   : > { %v1171_v61 = vsel %vm1165_vm2, %v1138_v27, %v3382_v39  ;;  %v1005_v39 = vshll.u32 %v3408_v55, 16  ;;  %v1956_v54 = vshll.u32 %v2703_v23, 16 }
  0xa9   : > { %1856 = vrot.lane.b32.xlu0 %v1846_v35, %s3072_s9  ;;  %v862_v48 = vpop.permute.xlu1 %861 }
  0xaa   : > { %v1202_v15 = vsel %vm1198_vm3, %v1169_v10, %v862_v48  ;;  %v2483_v48 = vld [vmem:[%s3157_s5 + $0x60] sm:$0xf]  ;;  %v1007_v53 = vrot.slane %v1005_v39, 1  ;;  %v1958_v4 = vrot.slane %v1956_v54, 1  ;;  %v1951_v10 = vrot.slane %v1949_v63, 1 }
  0xab   : > { %v860_v50 = vpop.permute.xlu0 %859  ;;  %1894 = vrot.lane.b32.xlu1 %v2693_v28, %s3067_s10  ;;  %v2563_v57 = vcombine.low %v2483_v48, %v2483_v48  ;;  %v3533_v39 = vld [vmem:[%s3260_s30 + $0x34] sm:$0x1]  ;;  %v2647_v54 = vld [vmem:[%s3260_s30 + $0x28] sm:$0xe] }
  0xac   : > { %v1200_v17 = vsel %vm1198_vm3, %v1167_v13, %v860_v50  ;;  %v2644_v13 = vld [vmem:[%s3260_s30 + $0x10] sm:$0xe]  ;;  %v1952_v21 = vor.u32 %v1951_v10, %v1947_v8 }
  0xad   : > { %1892 = vrot.lane.b32.xlu0 %v2692_v43, %s3067_s10  ;;  %v866_v1 = vpop.permute.xlu1 %865  ;;  %v2484_v43 = vld [vmem:[%s3157_s5 + $0x68] sm:$0xf]  ;;  %v2708_v24 = vcombine.low %v2644_v13, %v3390_v49 }
  0xae   : > { %v1206_v32 = vsel %vm1198_vm3, %v1173_v26, %v866_v1  ;;  %v2564_v51 = vcombine.low %v2484_v43, %v2484_v43  ;;  %v2499_v1 = vld [vmem:[%s3157_s5 + $0x64] sm:$0x1] }
  0xaf   : > { %v864_v2 = vpop.permute.xlu0 %863  ;;  %801 = vrot.lane.b32.xlu1 %v750_v52, %s3067_s10  ;;  %v1003_v52 = vshrl.u32 %v3408_v55, 16  ;;  %v2579_v14 = vcombine.low %v2483_v48, %v2499_v1  ;;  %v2711_v1 = vcombine.low %v2647_v54, %v3445_v30 }
  0xb0   : > { %v1204_v35 = vsel %vm1198_vm3, %v1171_v61, %v864_v2 }
  0xb1   : > { %799 = vrot.lane.b32.xlu0 %v743_v60, %s3067_s10  ;;  %v1054_v16 = vpop.permute.xlu1 %1053  ;;  %v1000_v60 = vrot.slane %v998_v44, 1  ;;  %v1008_v55 = vor.u32 %v1007_v53, %v1003_v52  ;;  %v2031_v8 = vrot.slane %v2711_v1, 1 }
  0xb2   : > { %v1235_v19 = vsel %vm1231_vm4, %v1202_v15, %v1054_v16  ;;  %v3496_v15 = vld [vmem:[%s3260_s30 + $0x20] sm:$0xf]  ;;  %v3499_v16 = vld [vmem:[%s3260_s30 + $0x24] sm:$0x1] }
  0xb3   : > { %v1052_v47 = vpop.permute.xlu0 %1051  ;;  %877 = vrot.lane.b32.xlu1 %v2562_v3, %s3068_s13  ;;  %v2580_v3 = vcombine.low %v2484_v43, %v2500_v56  ;;  %v1001_v7 = vor.u32 %v1000_v60, %v996_v59  ;;  %v2656_v5 = vcombine.low %v3496_v15, %v3499_v16  ;;  %v2646_v59 = vld [vmem:[%s3260_s30 + $0x20] sm:$0xe] }
  0xb4   : > { %v1233_v9 = vsel %vm1231_vm4, %v1200_v17, %v1052_v47  ;;  %v2709_v17 = vcombine.low %v2645_v6, %v3387_v42  ;;  %v2987_v42 = vld [vmem:[%s4097_s3 + $0x8] sm:$0xff]  }
  0xb5   : > { %875 = vrot.lane.b32.xlu0 %v2561_v22, %s3068_s13  ;;  %v2585_v29 = vcombine.low %v1233_v9, %v1235_v19  ;;  %v1058_v33 = vpop.permute.xlu1 %1057  ;;  %v1954_v22 = vshrl.u32 %v2703_v23, 16  ;;  %v1019_v47 = vshll.u32 %v2580_v3, 16  ;;  %v1012_v9 = vshll.u32 %v2579_v14, 16  ;;  %2775 = vmatprep.subr.bf16.mxu1 %v2987_v42 }
  0xb6   : > { %v1239_v62 = vsel %vm1231_vm4, %v1206_v32, %v1058_v33  ;;  %v2029_v27 = vrot.slane %v2709_v17, 1  ;;  %2776 = vmatpush3.bf16.msra.mxu1 %v2987_v42  ;;  %v2988_v32 = vld [vmem:[%s4097_s3 + $0x10] ss:$0 sps:$4 sm:$0x33]   ;;  %v2028_v33 = vrot.slane %v2708_v24, 1  ;;  %v1593_v52 = vshrl.u32 %v2656_v5, 16 }
  0xb7   : > { %2757 = vmatprep.mubr.msk.bf16.mxu0 %vm1328_vm5, %v2585_v29  ;;  %v1056_v36 = vpop.permute.xlu0 %1055  ;;  %1898 = vrot.lane.b32.xlu1 %v2695_v18, %s3067_s10  ;;  %v1959_v19 = vor.u32 %v1958_v4, %v1954_v22  ;;  %v1017_v29 = vshrl.u32 %v2580_v3, 16  ;;  %v1021_v49 = vrot.slane %v1019_v47, 1  ;;  %v2247_v40 = vsel %vm2245_vm6, %v2988_v32, 0  ;;  %v2989_v24 = vld [vmem:[%s3157_s5 + $0x28] sm:$0xf] }
  0xb8   : > { %v1237_v37 = vsel %vm1231_vm4, %v1204_v35, %v1056_v36  ;;  %v1010_v35 = vshrl.u32 %v2579_v14, 16  ;;  %v1595_v36 = vshll.u32 %v2656_v5, 16  ;;  %2787 = vmatprep.subr.msk.bf16.mxu1 %vm2245_vm6, %v2988_v32  ;;  %v2710_v22 = vcombine.low %v2646_v59, %v3451_v34  ;;  %v1471_v14 = vld [vmem:[%s3260_s30 + $0x28] sm:$0xe]  ;;  %v2990_v42 = vld [vmem:[%s3157_s5 + $0x20] sm:$0xf] }
  0xb9   : > { %v2586_v28 = vcombine.low %v1237_v37, %v1239_v62  ;;  %1896 = vrot.lane.b32.xlu0 %v2694_v20, %s3067_s10  ;;  %v3464_v45 = vpop.permute.xlu1 %517  ;;  %v2657_v20 = vcombine.low %v3487_v11, %v3490_v46  ;;  %v1014_v62 = vrot.slane %v1012_v9, 1  ;;  %v3527_v37 = vld [vmem:[%s3260_s30 + $0x3c] sm:$0x1]  ;;  %v2665_v47 = vcombine.low %v1471_v14, %v3490_v46  ;;  %v3574_v32 = vld [vmem:[%s3157_s5 + $0x68] sm:$0xf] }
  0xba   : > { %v2659_v48 = vcombine.low %v3519_v31, %v3527_v37  ;;  %2778 = vmatpush3.bf16.msra.mxu1 %v2247_v40  ;;  %v1597_v53 = vrot.slane %v1595_v36, 1  ;;  %v2030_v30 = vrot.slane %v2710_v22, 1  ;;  %v1101_v9 = vsel %vm1083_vm0, %v2989_v24, %v3464_v45  ;;  %4109 = vst [vmem:[#allocation7_spill] sm:$0xff] %v3574_v32  ;;  %v3614_v14 = vld [vmem:[%s3260_s30 + $0x34] sm:$0x1] }
  0xbb   : > { %2758 = vmatmul.mubr.msk.bf16.vlgmr.msra.gmra.mrb[0].mxu0 %vm1328_vm5, %v2586_v28  ;;  %v3468_v50 = vpop.permute.xlu0 %515  ;;  %1990 = vrot.lane.b32.xlu1 %v1945_v38, %s3073_s11  ;;  %v1602_v61 = vshll.u32 %v2657_v20, 16  ;;  %v3530_v38 = vld [vmem:[%s3260_s30 + $0x30] sm:$0xf]  ;;  %v1600_v43 = vshrl.u32 %v2657_v20, 16  ;;  %v1665_v36 = vrot.slane %v2665_v47, 1 }
  0xbc   : > { %4108 = vst [vmem:[#allocation6_spill] sm:$0xff] %v3530_v38  ;;  %v2658_v56 = vcombine.low %v3530_v38, %v3533_v39  ;;  %v1616_v3 = vshll.u32 %v2659_v48, 16  ;;  %v1614_v10 = vshrl.u32 %v2659_v48, 16 }
  0xbd   : > { %1988 = vrot.lane.b32.xlu0 %v1938_v41, %s3073_s11  ;;  %v3475_v0 = vpop.permute.xlu1 %521  ;;  %v1022_v41 = vor.u32 %v1021_v49, %v1017_v29  ;;  %v1604_v44 = vrot.slane %v1602_v61, 1 }
  0xbe   : > { %v1609_v4 = vshll.u32 %v2658_v56, 16  ;;  %v1618_v13 = vrot.slane %v1616_v3, 1  ;;  %v1607_v17 = vshrl.u32 %v2658_v56, 16 }
  0xbf   : > { %v3478_v2 = vpop.permute.xlu0 %519  ;;  %881 = vrot.lane.b32.xlu1 %v2564_v51, %s3068_s13  ;;  %v1015_v51 = vor.u32 %v1014_v62, %v1010_v35  ;;  %v1605_v63 = vor.u32 %v1604_v44, %v1600_v43 }
  0xc0   : > { %v1619_v46 = vor.u32 %v1618_v13, %v1614_v10  ;;  %v2608_v10 = vld [vmem:[%s3260_s30 + $0x28] sm:$0xf]  ;;  %v3620_v13 = vld [vmem:[%s3260_s30 + $0x2c] sm:$0x1] }
  0xc1   : > { %879 = vrot.lane.b32.xlu0 %v2563_v57, %s3068_s13  ;;  %v3492_v12 = vpop.permute.xlu1 %597 }
  0xc2   : > { %v1144_v29 = vsel %vm1132_vm1, %v1101_v9, %v3492_v12  ;;  %v246_v12 = vld [vmem:[%s3157_s5 + $0x6c] sm:$0x1] }
  0xc3   : > { %v3501_v18 = vpop.permute.xlu0 %595  ;;  %1069 = vrot.lane.b32.xlu1 %v1008_v55, %s3069_s22  ;;  %v1598_v55 = vor.u32 %v1597_v53, %v1593_v52 }
  0xc5   : > { %1067 = vrot.lane.b32.xlu0 %v1001_v7, %s3069_s22  ;;  %v3514_v25 = vpop.permute.xlu1 %601  ;;  %v1470_v7 = vld [vmem:[%s3260_s30 + $0x20] sm:$0xe] }
  0xc6   : > { %v2664_v20 = vcombine.low %v1470_v7, %v3499_v16  ;;  %v1472_v16 = vld [vmem:[%s3260_s30 + $0x30] sm:$0xe] }
  0xc7   : > { %v3516_v26 = vpop.permute.xlu0 %599  ;;  %1994 = vrot.lane.b32.xlu1 %v1959_v19, %s3073_s11  ;;  %v1611_v19 = vrot.slane %v1609_v4, 1 }
  0xc8   : > { %v1664_v40 = vrot.slane %v2664_v20, 1  ;;  %v2672_v20 = vcombine.low %v2608_v10, %v2608_v10 }
  0xc9   : > { %1992 = vrot.lane.b32.xlu0 %v1952_v21, %s3073_s11  ;;  %v790_v23 = vpop.permute.xlu1 %789  ;;  %v1473_v21 = vld [vmem:[%s3260_s30 + $0x38] sm:$0xe]  ;;  %v1612_v61 = vor.u32 %v1611_v19, %v1607_v17 }
  0xca   : > { %v1177_v45 = vsel %vm1165_vm2, %v1144_v29, %v790_v23  ;;  %v2991_v23 = vld [vmem:[%s3157_s5 + $0x38] sm:$0xf]  ;;  %v3634_v29 = vld [vmem:[%s3157_s5 + $0x70] sm:$0xf] }
  0xcb   : > { %v788_v28 = vpop.permute.xlu0 %787  ;;  %2038 = vrot.lane.b32.xlu1 %v2029_v27, %s3068_s13  ;;  %v1098_v27 = vsel %vm1083_vm0, %v2990_v42, %v3468_v50  ;;  %v2667_v50 = vcombine.low %v1473_v21, %v3527_v37  ;;  %v1107_v43 = vsel %vm1083_vm0, %v2991_v23, %v3475_v0  ;;  %v2518_v0 = vcombine.low %v3574_v32, %v246_v12  ;;  %v248_v42 = vld [vmem:[%s3157_s5 + $0x7c] sm:$0x1]  ;;  %v2611_v12 = vld [vmem:[%s3260_s30 + $0x40] sm:$0xf] }
  0xcc   : > { %v1142_v49 = vsel %vm1132_vm1, %v1098_v27, %v3501_v18  ;;  %v245_v18 = vld [vmem:[%s3157_s5 + $0x64] sm:$0x1]  ;;  %v1148_v53 = vsel %vm1132_vm1, %v1107_v43, %v3514_v25  ;;  %v2680_v21 = vcombine.low %v2608_v10, %v3620_v13  ;;  %4112 = vst [vmem:[#allocation10_spill] sm:$0xff] %v3634_v29 }
  0xcd   : > { %2036 = vrot.lane.b32.xlu0 %v2028_v33, %s3068_s13  ;;  %v3542_v57 = vpop.permute.xlu1 %793  ;;  %v1175_v33 = vsel %vm1165_vm2, %v1142_v49, %v788_v28  ;;  %v2992_v28 = vld [vmem:[%s3157_s5 + $0x30] sm:$0xf]  ;;  %v1667_v22 = vrot.slane %v2667_v50, 1  ;;  %v489_v4 = vshll.u32 %v2518_v0, 16 }
  0xce   : > { %v1104_v52 = vsel %vm1083_vm0, %v2992_v28, %v3478_v2  ;;  %v1181_v59 = vsel %vm1165_vm2, %v1148_v53, %v3542_v57 }
  0xcf   : > { %v3545_v60 = vpop.permute.xlu0 %791  ;;  %1073 = vrot.lane.b32.xlu1 %v1022_v41, %s3069_s22  ;;  %v3580_v41 = vld [vmem:[%s3157_s5 + $0x60] sm:$0xf]  ;;  %v1146_v56 = vsel %vm1132_vm1, %v1104_v52, %v3516_v26  ;;  %v491_v47 = vrot.slane %v489_v4, 1 }
  0xd0   : > { %4110 = vst [vmem:[#allocation8_spill] sm:$0xff] %v3580_v41  ;;  %v2517_v2 = vcombine.low %v3580_v41, %v245_v18  ;;  %v1179_v25 = vsel %vm1165_vm2, %v1146_v56, %v3545_v60  ;;  %v2675_v18 = vcombine.low %v2611_v12, %v2611_v12 }
  0xd1   : > { %1071 = vrot.lane.b32.xlu0 %v1015_v51, %s3069_s22  ;;  %v870_v6 = vpop.permute.xlu1 %869  ;;  %v2666_v51 = vcombine.low %v1472_v16, %v3533_v39 }
  0xd2   : > { %v1210_v35 = vsel %vm1198_vm3, %v1177_v45, %v870_v6  ;;  %v482_v7 = vshll.u32 %v2517_v2, 16  ;;  %v480_v24 = vshrl.u32 %v2517_v2, 16 }
  0xd3   : > { %v868_v58 = vpop.permute.xlu0 %867  ;;  %1630 = vrot.lane.b32.xlu1 %v1605_v63, %s3070_s27  ;;  %v1666_v60 = vrot.slane %v2666_v51, 1  ;;  %v1777_v51 = vshrl.u32 %v2680_v21, 16 }
  0xd4   : > { %v1208_v37 = vsel %vm1198_vm3, %v1175_v33, %v868_v58  ;;  %v2609_v58 = vld [vmem:[%s3260_s30 + $0x30] sm:$0xf]  ;;  %v484_v9 = vrot.slane %v482_v7, 1  ;;  %v1779_v33 = vshll.u32 %v2680_v21, 16  ;;  %v2453_v7 = vld [vmem:[%s3157_s5 + $0x68] sm:$0xf] }
  0xd5   : > { %1628 = vrot.lane.b32.xlu0 %v1598_v55, %s3070_s27  ;;  %v874_v34 = vpop.permute.xlu1 %873  ;;  %v2673_v17 = vcombine.low %v2609_v58, %v2609_v58  ;;  %v2681_v19 = vcombine.low %v2609_v58, %v3614_v14  ;;  %v2470_v21 = vld [vmem:[%s3157_s5 + $0x74] sm:$0x1] }
  0xd6   : > { %v1214_v63 = vsel %vm1198_vm3, %v1181_v59, %v874_v34  ;;  %v487_v34 = vshrl.u32 %v2518_v0, 16  ;;  %v485_v50 = vor.u32 %v484_v9, %v480_v24  ;;  %v1781_v28 = vrot.slane %v1779_v33, 1  ;;  %v2624_v33 = vld [vmem:[%s3260_s30 + $0x28] sm:$0xe] }
  0xd7   : > { %v872_v5 = vpop.permute.xlu0 %871  ;;  %2042 = vrot.lane.b32.xlu1 %v2031_v8, %s3068_s13  ;;  %v1786_v45 = vshll.u32 %v2681_v19, 16  ;;  %v1784_v23 = vshrl.u32 %v2681_v19, 16  ;;  %v2533_v24 = vcombine.low %v2453_v7, %v2453_v7 }
  0xd8   : > { %v1212_v3 = vsel %vm1198_vm3, %v1179_v25, %v872_v5  ;;  %v3630_v5 = vld [vmem:[%s3157_s5 + $0x78] sm:$0xf]  ;;  %v492_v49 = vor.u32 %v491_v47, %v487_v34 }
  0xd9   : > { %2040 = vrot.lane.b32.xlu0 %v2030_v30, %s3068_s13  ;;  %v1062_v62 = vpop.permute.xlu1 %1061  ;;  %4111 = vst [vmem:[#allocation9_spill] sm:$0xff] %v3630_v5  ;;  %v1788_v43 = vrot.slane %v1786_v45, 1  ;;  %v2993_v47 = vld [vmem:[%s3260_s30 + $0x18] sm:$0xf] }
  0xda   : > { %v1243_v44 = vsel %vm1231_vm4, %v1210_v35, %v1062_v62 }
  0xdb   : > { %v1060_v48 = vpop.permute.xlu0 %1059  ;;  %1634 = vrot.lane.b32.xlu1 %v1619_v46, %s3070_s27  ;;  %v247_v46 = vld [vmem:[%s3157_s5 + $0x74] sm:$0x1]  ;;  %v1789_v59 = vor.u32 %v1788_v43, %v1784_v23 }
  0xdc   : > { %v1241_v54 = vsel %vm1231_vm4, %v1208_v37, %v1060_v48  ;;  %v2519_v35 = vcombine.low %v3634_v29, %v247_v46  ;;  %v2625_v46 = vld [vmem:[%s3260_s30 + $0x30] sm:$0xe] }
  0xdd   : > { %v2587_v39 = vcombine.low %v1241_v54, %v1243_v44  ;;  %1632 = vrot.lane.b32.xlu0 %v1612_v61, %s3070_s27  ;;  %v1066_v1 = vpop.permute.xlu1 %1065  ;;  %v2520_v61 = vcombine.low %v3630_v5, %v248_v42  ;;  %v3652_v44 = vld [vmem:[%s3260_s30 + $0x44] sm:$0x1]  ;;  %v3655_v54 = vld [vmem:[%s3260_s30 + $0x3c] sm:$0x1]  ;;  %v2689_v43 = vcombine.low %v2625_v46, %v3614_v14  ;;  %v2456_v14 = vld [vmem:[%s3157_s5 + $0x80] sm:$0xf] }
  0xde   : > { %v1247_v26 = vsel %vm1231_vm4, %v1214_v63, %v1066_v1  ;;  %v496_v52 = vshll.u32 %v2519_v35, 16  ;;  %v2683_v56 = vcombine.low %v2611_v12, %v3652_v44  ;;  %v1782_v63 = vor.u32 %v1781_v28, %v1777_v51  ;;  %v2469_v12 = vld [vmem:[%s3157_s5 + $0x6c] sm:$0x1] }
  0xdf   : > { %2761 = vmatprep.mubr.msk.bf16.mxu0 %vm1328_vm5, %v2587_v39  ;;  %v1064_v57 = vpop.permute.xlu0 %1063  ;;  %1678 = vrot.lane.b32.xlu1 %v1665_v36, %s3066_s7  ;;  %v2610_v36 = vld [vmem:[%s3260_s30 + $0x38] sm:$0xf]  ;;  %v503_v37 = vshll.u32 %v2520_v61, 16  ;;  %v501_v39 = vshrl.u32 %v2520_v61, 16  ;;  %v494_v1 = vshrl.u32 %v2519_v35, 16  ;;  %v2688_v51 = vcombine.low %v2624_v33, %v3620_v13 }
  0xe0   : > { %v1245_v55 = vsel %vm1231_vm4, %v1212_v3, %v1064_v57  ;;  %v2674_v48 = vcombine.low %v2610_v36, %v2610_v36  ;;  %v2682_v25 = vcombine.low %v2610_v36, %v3655_v54  ;;  %v498_v3 = vrot.slane %v496_v52, 1  ;;  %v2455_v13 = vld [vmem:[%s3157_s5 + $0x78] sm:$0xf]  ;;  %v2632_v33 = vld [vmem:[%s3260_s30 + $0x30] sm:$0xf] }
  0xe1   : > { %v2588_v6 = vcombine.low %v1245_v55, %v1247_v26  ;;  %1676 = vrot.lane.b32.xlu0 %v1664_v40, %s3066_s7  ;;  %v3616_v8 = vpop.permute.xlu1 %1622  ;;  %v505_v2 = vrot.slane %v503_v37, 1  ;;  %v1798_v19 = vshrl.u32 %v2683_v56, 16  ;;  %v2549_v37 = vcombine.low %v2453_v7, %v2469_v12  ;;  %v2471_v7 = vld [vmem:[%s3157_s5 + $0x7c] sm:$0x1] }
  0xe2   : > { %v499_v4 = vor.u32 %v498_v3, %v494_v1  ;;  %v1791_v9 = vshrl.u32 %v2682_v25, 16  ;;  %v2472_v3 = vld [vmem:[%s3157_s5 + $0x84] sm:$0x1] }
  0xe3   : > { %2762 = vmatmul.mubr.msk.bf16.gmra.mrb[4].mxu0 %vm1328_vm5, %v2588_v6  ;;  %v3623_v30 = vpop.permute.xlu0 %1620  ;;  %1682 = vrot.lane.b32.xlu1 %v1667_v22, %s3066_s7  ;;  %v506_v55 = vor.u32 %v505_v2, %v501_v39  ;;  %v1800_v22 = vshll.u32 %v2683_v56, 16  ;;  %v2454_v6 = vld [vmem:[%s3157_s5 + $0x70] sm:$0xf]  ;;  %v1848_v56 = vrot.slane %v2688_v51, 1 }
  0xe4   : > { %v2550_v23 = vcombine.low %v2454_v6, %v2470_v21  ;;  %v2551_v21 = vcombine.low %v2455_v13, %v2471_v7  ;;  %v2635_v7 = vld [vmem:[%s3260_s30 + $0x48] sm:$0xf] }
  0xe5   : > { %1680 = vrot.lane.b32.xlu0 %v1666_v60, %s3066_s7  ;;  %v1627_v27 = vpop.permute.xlu1 %1626  ;;  %v1793_v60 = vshll.u32 %v2682_v25, 16  ;;  %v1802_v34 = vrot.slane %v1800_v22, 1  ;;  %v2536_v25 = vcombine.low %v2456_v14, %v2456_v14  ;;  %v752_v22 = vshrl.u32 %v2549_v37, 16 }
  0xe7   : > { %v3637_v16 = vpop.permute.xlu0 %1624  ;;  %1718 = vrot.lane.b32.xlu1 %v2673_v17, %s3071_s8  ;;  %v2534_v17 = vcombine.low %v2454_v6, %v2454_v6  ;;  %v1795_v42 = vrot.slane %v1793_v60, 1  ;;  %v2627_v6 = vld [vmem:[%s3260_s30 + $0x40] sm:$0xe] }
  0xe9   : > { %1716 = vrot.lane.b32.xlu0 %v2672_v20, %s3071_s8  ;;  %v3644_v62 = vpop.permute.xlu1 %1670  ;;  %v2064_v20 = vsel %vm2052_vm7, %v2993_v47, %v1627_v27 }
  0xeb   : > { %v3647_v40 = vpop.permute.xlu0 %1668  ;;  %533 = vrot.lane.b32.xlu1 %v492_v49, %s3066_s7  ;;  %v2994_v49 = vld [vmem:[%s3260_s30 + $0x10] sm:$0xf] }
  0xec   : > { %v2061_v45 = vsel %vm2052_vm7, %v2994_v49, %v3637_v16  ;;  %v1803_v16 = vor.u32 %v1802_v34, %v1798_v19  ;;  %v2552_v34 = vcombine.low %v2456_v14, %v2472_v3 }
  0xed   : > { %531 = vrot.lane.b32.xlu0 %v485_v50, %s3066_s7  ;;  %v1675_v53 = vpop.permute.xlu1 %1674 }
  0xee   : > { %v2084_v61 = vsel %vm1083_vm0, %v2064_v20, %v1675_v53  ;;  %v1849_v53 = vrot.slane %v2689_v43, 1  ;;  %v2691_v20 = vcombine.low %v2627_v6, %v3652_v44  ;;  %v2633_v44 = vld [vmem:[%s3260_s30 + $0x38] sm:$0xf]  ;;  %v2696_v43 = vcombine.low %v2632_v33, %v2632_v33 }
  0xef   : > { %v1673_v0 = vpop.permute.xlu0 %1672  ;;  %1722 = vrot.lane.b32.xlu1 %v2675_v18, %s3071_s8 }
  0xf0   : > { %v2082_v35 = vsel %vm1083_vm0, %v2061_v45, %v1673_v0  ;;  %v761_v0 = vshll.u32 %v2550_v23, 16  ;;  %v1851_v49 = vrot.slane %v2691_v20, 1  ;;  %v775_v45 = vshll.u32 %v2552_v34, 16  ;;  %v2634_v20 = vld [vmem:[%s3260_s30 + $0x40] sm:$0xf] }
  0xf1   : > { %1720 = vrot.lane.b32.xlu0 %v2674_v48, %s3071_s8  ;;  %v3661_v26 = vpop.permute.xlu1 %1710  ;;  %v1796_v48 = vor.u32 %v1795_v42, %v1791_v9 }
  0xf2   : > { %v763_v1 = vrot.slane %v761_v0, 1 }
  0xf3   : > { %v3663_v57 = vpop.permute.xlu0 %1708  ;;  %1814 = vrot.lane.b32.xlu1 %v1789_v59, %s3065_s6  ;;  %v754_v59 = vshll.u32 %v2549_v37, 16  ;;  %v766_v37 = vshrl.u32 %v2551_v21, 16 }
  0xf5   : > { %1812 = vrot.lane.b32.xlu0 %v1782_v63, %s3065_s6  ;;  %v3668_v58 = vpop.permute.xlu1 %525  ;;  %v759_v63 = vshrl.u32 %v2550_v23, 16  ;;  %v777_v23 = vrot.slane %v775_v45, 1 }
  0xf7   : > { %v3671_v10 = vpop.permute.xlu0 %523  ;;  %537 = vrot.lane.b32.xlu1 %v506_v55, %s3066_s7  ;;  %v2535_v55 = vcombine.low %v2455_v13, %v2455_v13  ;;  %v764_v47 = vor.u32 %v763_v1, %v759_v63  ;;  %v2485_v1 = vld [vmem:[%s3157_s5 + $0x70] sm:$0xf] }
  0xf8   : > { %v2565_v6 = vcombine.low %v2485_v1, %v2485_v1 }
  0xf9   : > { %535 = vrot.lane.b32.xlu0 %v499_v4, %s3066_s7  ;;  %v1715_v50 = vpop.permute.xlu1 %1714  ;;  %v756_v4 = vrot.slane %v754_v59, 1 }
  0xfa   : > { %v3687_v27 = vsel %vm2093_vm8, %v2084_v61, %v1715_v50  ;;  %v768_v50 = vshll.u32 %v2551_v21, 16 }
  0xfb   : > { %v1713_v36 = vpop.permute.xlu0 %1712  ;;  %613 = vrot.lane.b32.xlu1 %v2534_v17, %s3065_s6  ;;  %v2626_v17 = vld [vmem:[%s3260_s30 + $0x38] sm:$0xe] }
  0xfc   : > { %v3690_v18 = vsel %vm2093_vm8, %v2082_v35, %v1713_v36  ;;  %v2690_v9 = vcombine.low %v2626_v17, %v3655_v54  ;;  %v2697_v54 = vcombine.low %v2633_v44, %v2633_v44  ;;  %v773_v36 = vshrl.u32 %v2552_v34, 16 }
  0xfd   : > { %611 = vrot.lane.b32.xlu0 %v2533_v24, %s3065_s6  ;;  %v3696_v28 = vpop.permute.xlu1 %1806  ;;  %v757_v24 = vor.u32 %v756_v4, %v752_v22  ;;  %v2502_v4 = vld [vmem:[%s3157_s5 + $0x7c] sm:$0x1] }
  0xfe   : > { %v1850_v61 = vrot.slane %v2690_v9, 1  ;;  %v778_v14 = vor.u32 %v777_v23, %v773_v36  ;;  %v2699_v9 = vcombine.low %v2635_v7, %v2635_v7  ;;  %v3774_v23 = vld [vmem:[%s3260_s30 + $0x44] sm:$0x1] }
  0xff   : > { %v3698_v52 = vpop.permute.xlu0 %1804  ;;  %1818 = vrot.lane.b32.xlu1 %v1803_v16, %s3065_s6  ;;  %v3737_v16 = vld [vmem:[%s3260_s30 + $0x3c] sm:$0x1] }
 0x101   : > { %1816 = vrot.lane.b32.xlu0 %v1796_v48, %s3065_s6  ;;  %v3703_v39 = vpop.permute.xlu1 %529  ;;  %v770_v48 = vrot.slane %v768_v50, 1  ;;  %v2698_v50 = vcombine.low %v2634_v20, %v2634_v20 }
 0x103   : > { %v3706_v2 = vpop.permute.xlu0 %527  ;;  %1862 = vrot.lane.b32.xlu1 %v1849_v53, %s3072_s9  ;;  %v3742_v53 = vld [vmem:[%s3260_s30 + $0x34] sm:$0x1]  ;;  %v771_v13 = vor.u32 %v770_v48, %v766_v37 }
 0x104   : > { %v2704_v59 = vcombine.low %v2632_v33, %v3742_v53 }
 0x105   : > { %1860 = vrot.lane.b32.xlu0 %v1848_v56, %s3072_s9  ;;  %v3712_v60 = vpop.permute.xlu1 %605  ;;  %v2705_v56 = vcombine.low %v2633_v44, %v3737_v16  ;;  %v3769_v44 = vld [vmem:[%s3260_s30 + $0x4c] sm:$0x1] }
 0x106   : > { %v1963_v17 = vshll.u32 %v2704_v59, 16  ;;  %v1961_v33 = vshrl.u32 %v2704_v59, 16  ;;  %v2707_v37 = vcombine.low %v2635_v7, %v3769_v44  ;;  %v2488_v59 = vld [vmem:[%s3157_s5 + $0x88] sm:$0xf] }
 0x107   : > { %v3716_v19 = vpop.permute.xlu0 %603  ;;  %617 = vrot.lane.b32.xlu1 %v2536_v25, %s3065_s6  ;;  %v2486_v25 = vld [vmem:[%s3157_s5 + $0x78] sm:$0xf]  ;;  %v1970_v22 = vshll.u32 %v2705_v56, 16 }
 0x108   : > { %v1982_v5 = vshrl.u32 %v2707_v37, 16 }
 0x109   : > { %615 = vrot.lane.b32.xlu0 %v2535_v55, %s3065_s6  ;;  %v3722_v42 = vpop.permute.xlu1 %1810  ;;  %v2566_v55 = vcombine.low %v2486_v25, %v2486_v25  ;;  %v1972_v45 = vrot.slane %v1970_v22, 1 }
 0x10b   : > { %v3724_v46 = vpop.permute.xlu0 %1808  ;;  %805 = vrot.lane.b32.xlu1 %v764_v47, %s3067_s10  ;;  %v2501_v47 = vld [vmem:[%s3157_s5 + $0x74] sm:$0x1] }
 0x10d   : > { %803 = vrot.lane.b32.xlu0 %v757_v24, %s3067_s10  ;;  %v3729_v12 = vpop.permute.xlu1 %1854  ;;  %v2582_v24 = vcombine.low %v2486_v25, %v2502_v4  ;;  %v2568_v4 = vcombine.low %v2488_v59, %v2488_v59 }
 0x10f   : > { %v3732_v35 = vpop.permute.xlu0 %1852  ;;  %1866 = vrot.lane.b32.xlu1 %v1851_v49, %s3072_s9  ;;  %v1968_v49 = vshrl.u32 %v2705_v56, 16  ;;  %v1033_v56 = vshll.u32 %v2582_v24, 16 }
 0x111   : > { %1864 = vrot.lane.b32.xlu0 %v1850_v61, %s3072_s9  ;;  %v3739_v51 = vpop.permute.xlu1 %609  ;;  %v2581_v61 = vcombine.low %v2485_v1, %v2501_v47  ;;  %v1973_v48 = vor.u32 %v1972_v45, %v1968_v49  ;;  %v1035_v7 = vrot.slane %v1033_v56, 1  ;;  %v2504_v47 = vld [vmem:[%s3157_s5 + $0x8c] sm:$0x1] }
 0x112   : > { %v2584_v29 = vcombine.low %v2488_v59, %v2504_v47 }
 0x113   : > { %v3744_v0 = vpop.permute.xlu0 %607  ;;  %1902 = vrot.lane.b32.xlu1 %v2697_v54, %s3067_s10  ;;  %v1965_v54 = vrot.slane %v1963_v17, 1  ;;  %v1026_v25 = vshll.u32 %v2581_v61, 16  ;;  %v1984_v17 = vshll.u32 %v2707_v37, 16 }
 0x114   : > { %v1047_v37 = vshll.u32 %v2584_v29, 16 }
 0x115   : > { %1900 = vrot.lane.b32.xlu0 %v2696_v43, %s3067_s10  ;;  %v3751_v63 = vpop.permute.xlu1 %797  ;;  %v1028_v49 = vrot.slane %v1026_v25, 1  ;;  %v2648_v25 = vld [vmem:[%s3260_s30 + $0x30] sm:$0xe] }
 0x117   : > { %v3754_v3 = vpop.permute.xlu0 %795  ;;  %809 = vrot.lane.b32.xlu1 %v778_v14, %s3067_s10  ;;  %v2706_v14 = vcombine.low %v2634_v20, %v3774_v23 }
 0x119   : > { %807 = vrot.lane.b32.xlu0 %v771_v13, %s3067_s10  ;;  %v3760_v34 = vpop.permute.xlu1 %1858  ;;  %v1966_v13 = vor.u32 %v1965_v54, %v1961_v33  ;;  %v1977_v45 = vshll.u32 %v2706_v14, 16  ;;  %v2503_v33 = vld [vmem:[%s3157_s5 + $0x84] sm:$0x1]  ;;  %v1975_v41 = vshrl.u32 %v2706_v14, 16  ;;  %v2712_v14 = vcombine.low %v2648_v25, %v3742_v53  ;;  %v2995_v53 = vld [vmem:[%s3157_s5 + $0x48] sm:$0xf] }
 0x11b   : > { %v3764_v21 = vpop.permute.xlu0 %1856  ;;  %885 = vrot.lane.b32.xlu1 %v2566_v55, %s3068_s13  ;;  %v2487_v55 = vld [vmem:[%s3157_s5 + $0x80] sm:$0xf]  ;;  %v1979_v32 = vrot.slane %v1977_v45, 1  ;;  %v2651_v45 = vld [vmem:[%s3260_s30 + $0x48] sm:$0xe] }
 0x11c   : > { %v2567_v20 = vcombine.low %v2487_v55, %v2487_v55  ;;  %v2583_v56 = vcombine.low %v2487_v55, %v2503_v33  ;;  %v1113_v33 = vsel %vm1083_vm0, %v2995_v53, %v3668_v58 }
 0x11d   : > { %883 = vrot.lane.b32.xlu0 %v2565_v6, %s3068_s13  ;;  %v3771_v36 = vpop.permute.xlu1 %1894  ;;  %v1031_v6 = vshrl.u32 %v2582_v24, 16  ;;  %v1986_v24 = vrot.slane %v1984_v17, 1  ;;  %v1980_v55 = vor.u32 %v1979_v32, %v1975_v41  ;;  %v2650_v41 = vld [vmem:[%s3260_s30 + $0x40] sm:$0xe] }
 0x11f   : > { %v3776_v43 = vpop.permute.xlu0 %1892  ;;  %1906 = vrot.lane.b32.xlu1 %v2699_v9, %s3067_s10  ;;  %v1024_v9 = vshrl.u32 %v2581_v61, 16  ;;  %v2649_v61 = vld [vmem:[%s3260_s30 + $0x38] sm:$0xe]  ;;  %v1987_v59 = vor.u32 %v1986_v24, %v1982_v5  ;;  %v1045_v5 = vshrl.u32 %v2584_v29, 16  ;;  %v2996_v24 = vld [vmem:[%s3157_s5 + $0x40] sm:$0xf] }
 0x120   : > { %v1110_v29 = vsel %vm1083_vm0, %v2996_v24, %v3671_v10  ;;  %v2714_v10 = vcombine.low %v2650_v41, %v3774_v23  ;;  %v3000_v24 = vld [vmem:[%s3157_s5 + $0x50] sm:$0xf] }
 0x121   : > { %1904 = vrot.lane.b32.xlu0 %v2698_v50, %s3067_s10  ;;  %v3783_v1 = vpop.permute.xlu1 %801  ;;  %v1150_v25 = vsel %vm1132_vm1, %v1110_v29, %v3716_v19 }
 0x123   : > { %v3786_v22 = vpop.permute.xlu0 %799  ;;  %1998 = vrot.lane.b32.xlu1 %v1973_v48, %s3073_s11  ;;  %v1036_v48 = vor.u32 %v1035_v7, %v1031_v6  ;;  %v1040_v6 = vshll.u32 %v2583_v56, 16 }
 0x125   : > { %1996 = vrot.lane.b32.xlu0 %v1966_v13, %s3073_s11  ;;  %v878_v50 = vpop.permute.xlu1 %877  ;;  %v1029_v13 = vor.u32 %v1028_v49, %v1024_v9  ;;  %v1038_v9 = vshrl.u32 %v2583_v56, 16  ;;  %v1042_v49 = vrot.slane %v1040_v6, 1 }
 0x127   : > { %v876_v54 = vpop.permute.xlu0 %875  ;;  %889 = vrot.lane.b32.xlu1 %v2568_v4, %s3068_s13  ;;  %v2713_v4 = vcombine.low %v2649_v61, %v3737_v16  ;;  %v2032_v16 = vrot.slane %v2712_v14, 1  ;;  %v2715_v61 = vcombine.low %v2651_v45, %v3769_v44  ;;  %v2997_v14 = vld [vmem:[%s3260_s30 + $0x8] sm:$0xf] }
 0x129   : > { %887 = vrot.lane.b32.xlu0 %v2567_v20, %s3068_s13  ;;  %v3795_v38 = vpop.permute.xlu1 %1898  ;;  %v2033_v47 = vrot.slane %v2713_v4, 1  ;;  %v1049_v20 = vrot.slane %v1047_v37, 1  ;;  %v2035_v23 = vrot.slane %v2715_v61, 1 }
 0x12b   : > { %v3798_v31 = vpop.permute.xlu0 %1896  ;;  %1077 = vrot.lane.b32.xlu1 %v1036_v48, %s3069_s22  ;;  %v1050_v56 = vor.u32 %v1049_v20, %v1045_v5  ;;  %v2034_v5 = vrot.slane %v2714_v10, 1 }
 0x12d   : > { %1075 = vrot.lane.b32.xlu0 %v1029_v13, %s3069_s22  ;;  %v1991_v7 = vpop.permute.xlu1 %1990  ;;  %v1152_v13 = vsel %vm1132_vm1, %v1113_v33, %v3712_v60  ;;  %v1183_v60 = vsel %vm1165_vm2, %v1150_v25, %v3754_v3 }
 0x12e   : > { %v1185_v58 = vsel %vm1165_vm2, %v1152_v13, %v3751_v63  ;;  %v1216_v44 = vsel %vm1198_vm3, %v1183_v60, %v876_v54  ;;  %v2058_v63 = vsel %vm2052_vm7, %v2997_v14, %v3616_v8 }
 0x12f   : > { %v3804_v17 = vpop.permute.xlu0 %1988  ;;  %2002 = vrot.lane.b32.xlu1 %v1987_v59, %s3073_s11  ;;  %v1043_v59 = vor.u32 %v1042_v49, %v1038_v9  ;;  %v1218_v4 = vsel %vm1198_vm3, %v1185_v58, %v878_v50  ;;  %v2080_v50 = vsel %vm1083_vm0, %v2058_v63, %v3644_v62 }
 0x130   : > { %v2097_v20 = vsel %vm2093_vm8, %v2080_v50, %v3661_v26  ;;  %v4114_v50 = vld [vmem:[#allocation6_spill] sm:$0xff] }
 0x131   : > { %2000 = vrot.lane.b32.xlu0 %v1980_v55, %s3073_s11  ;;  %v3809_v32 = vpop.permute.xlu1 %881  ;;  %s3074_s11 = smov [#allocation2]  }
 0x132   : > { %s3005_s12 = sshll.u32 %s3074_s11, 4  ;;  %s3006_s12 = int_to_ptr.vmem [resolvable:$false] %s3005_s12 }
 0x133   : > { %v3815_v48 = vpop.permute.xlu0 %879  ;;  %2046 = vrot.lane.b32.xlu1 %v2033_v47, %s3068_s13  ;;  %v2998_v47 = vld [vmem:[%s3260_s30] sm:$0xf]  ;;  %s3007_s14 = scalar_lea.vmem %s3006_s12, 4096 }
 0x134   : > { %v2055_v3 = vsel %vm2052_vm7, %v2998_v47, %v3623_v30  ;;  %v2113_v30 = vsel %vm1132_vm1, %v2097_v20, %v3696_v28 }
 0x135   : > { %2044 = vrot.lane.b32.xlu0 %v2032_v16, %s3068_s13  ;;  %v1070_v37 = vpop.permute.xlu1 %1069  ;;  %v2078_v8 = vsel %vm1083_vm0, %v2055_v3, %v3647_v40  ;;  %v2130_v40 = vsel %vm2126_vm9, %v2113_v30, %v3729_v12 }
 0x136   : > { %v1251_v55 = vsel %vm1231_vm4, %v1218_v4, %v1070_v37  ;;  %v2095_v9 = vsel %vm2093_vm8, %v2078_v8, %v3663_v57  ;;  %v2146_v57 = vsel %vm1165_vm2, %v2130_v40, %v3771_v36  ;;  %v1116_v36 = vsel %vm1083_vm0, %v3000_v24, %v3706_v2 }
 0x137   : > { %v1068_v19 = vpop.permute.xlu0 %1067  ;;  %1081 = vrot.lane.b32.xlu1 %v1050_v56, %s3069_s22  ;;  %v2111_v49 = vsel %vm1132_vm1, %v2095_v9, %v3698_v52  ;;  %v2163_v45 = vsel %vm2159_vm10, %v2146_v57, %v1991_v7  ;;  %v2999_v52 = vld [vmem:[%s3157_s5 + $0x58] sm:$0xf]  ;;  %v1154_v29 = vsel %vm1132_vm1, %v1116_v36, %v3744_v0  ;;  %s203_s5 = sand.u32 1, %s3055_s16  }
 0x138   : > { %v1249_v6 = vsel %vm1231_vm4, %v1216_v44, %v1068_v19  ;;  %v2128_v26 = vsel %vm2126_vm9, %v2111_v49, %v3732_v35  ;;  %v1119_v12 = vsel %vm1083_vm0, %v2999_v52, %v3703_v39  ;;  %v1187_v13 = vsel %vm1165_vm2, %v1154_v29, %v3786_v22  ;;  %s2438_s6 = sshll.u32 %s203_s5, 7  ;;  %s4052_s8 = scalar_lea.sflag [#allocation3], %s203_s5 }
 0x139   : > { %v2589_v54 = vcombine.low %v1249_v6, %v1251_v55  ;;  %1079 = vrot.lane.b32.xlu0 %v1043_v59, %s3069_s22  ;;  %v1995_v16 = vpop.permute.xlu1 %1994  ;;  %v2144_v28 = vsel %vm1165_vm2, %v2128_v26, %v3776_v43  ;;  %v1156_v43 = vsel %vm1132_vm1, %v1119_v12, %v3739_v51  ;;  %v1220_v51 = vsel %vm1198_vm3, %v1187_v13, %v3815_v48  ;;  %s4005_s10 = scalar_lea.vmem [#allocation2], %s2438_s6 }
 0x13a   : > { %v2161_v53 = vsel %vm2159_vm10, %v2144_v28, %v3804_v17  ;;  %v1189_v39 = vsel %vm1165_vm2, %v1156_v43, %v3783_v1  ;;  %v2117_v22 = vsel %vm1132_vm1, %v3687_v27, %v3722_v42  ;;  %v2115_v48 = vsel %vm1132_vm1, %v3690_v18, %v3724_v46  ;;  %s2360_s22 = sshll.u32 %s4005_s10, 4  ;;  %s4040_s22 = int_to_ptr.vmem [resolvable:$true] %s2360_s22 }
 0x13b   : > { %2765 = vmatprep.mubr.msk.bf16.mxu0 %vm1328_vm5, %v2589_v54  ;;  %v1993_v62 = vpop.permute.xlu0 %1992  ;;  %2050 = vrot.lane.b32.xlu1 %v2035_v23, %s3068_s13  ;;  %v1222_v56 = vsel %vm1198_vm3, %v1189_v39, %v3809_v32  ;;  %v2134_v59 = vsel %vm2126_vm9, %v2117_v22, %v3760_v34  ;;  %v2132_v10 = vsel %vm2126_vm9, %v2115_v48, %v3764_v21  ;;  %v4113_v23 = vld [vmem:[#allocation5_spill] sm:$0xff]  ;;  %s3001_s9 = scalar_lea.vmem %s4040_s22, 2048  ;;  %p3008_p0 = scmp.lt.s32.totalorder %s4040_s22, %s3006_s12 }
 0x13c   : > { %v2150_v60 = vsel %vm1165_vm2, %v2134_v59, %v3795_v38  ;;  %v2148_v4 = vsel %vm1165_vm2, %v2132_v10, %v3798_v31  ;;  %p3002_p11 = scmp.ne.s32.totalorder %s4040_s22, %s3001_s9  ;;  %p3009_p1 = scmp.lt.s32.totalorder %s3007_s14, %s3001_s9 }
 0x13d   : > { %2048 = vrot.lane.b32.xlu0 %v2034_v5, %s3068_s13  ;;  %v2039_v41 = vpop.permute.xlu1 %2038  ;;  %v2167_v27 = vsel %vm2159_vm10, %v2150_v60, %v1995_v16  ;;  %v2165_v37 = vsel %vm2159_vm10, %v2148_v4, %v1993_v62  ;;  %s2732_s13 = sshll.u32 %s3122_s19, 11 }
 0x13e   : > { %v2179_v35 = vsel %vm1198_vm3, %v2163_v45, %v2039_v41  ;;  %s4034_s27 = scalar_lea.hbm %s4098_s4, %s2732_s13  ;;  %p3003_p12 = pnand %p3002_p11, %p3139_p5 }
 0x13f   : > { %v2037_v33 = vpop.permute.xlu0 %2036  ;;  %p3010_p2 = por %p3009_p1, %p3008_p0 }
 0x140   : > { %v2177_v7 = vsel %vm1198_vm3, %v2161_v53, %v2037_v33  ;;  %p3004_p13 = pneg %p3003_p12 }
 0x141   : > { %v2716_v17 = vcombine.low %v2177_v7, %v2179_v35  ;;  %v1074_v2 = vpop.permute.xlu1 %1073 }
 0x142   : > { %v1255_v61 = vsel %vm1231_vm4, %v1222_v56, %v1074_v2  ;;  %p3011_p3 = pnand %p3010_p2, %p3004_p13 }
 0x143   : > { %2779 = vmatprep.mubr.msk.bf16.mxu1 %vm2232_vm11, %v2716_v17  ;;  %v1072_v25 = vpop.permute.xlu0 %1071 }
 0x144   : > { %v1253_v0 = vsel %vm1231_vm4, %v1220_v51, %v1072_v25 }
 0x145   : > { %v2590_v58 = vcombine.low %v1253_v0, %v1255_v61  ;;  %v1631_v1 = vpop.permute.xlu1 %1630 }
 0x146   : > { %v2070_v38 = vsel %vm2052_vm7, %v3487_v11, %v1631_v1 }
 0x147   : > { %2766 = vmatmul.mubr.msk.bf16.gmra.mrb[8].mxu0 %vm1328_vm5, %v2590_v58  ;;  %v1629_v32 = vpop.permute.xlu0 %1628 }
 0x148   : > { %v2067_v31 = vsel %vm2052_vm7, %v3496_v15, %v1629_v32 }
 0x149   : > { %v2043_v42 = vpop.permute.xlu1 %2042 }
 0x14a   : > { %v2183_v44 = vsel %vm1198_vm3, %v2167_v27, %v2043_v42  ;;  %v4115_v27 = vld [vmem:[#allocation7_spill] sm:$0xff] }
 0x14b   : > { %v2041_v18 = vpop.permute.xlu0 %2040 }
 0x14c   : > { %v2181_v46 = vsel %vm1198_vm3, %v2165_v37, %v2041_v18 }
 0x14d   : > { %v2717_v34 = vcombine.low %v2181_v46, %v2183_v44  ;;  %v1635_v55 = vpop.permute.xlu1 %1634  ;;  %v4116_v44 = vld [vmem:[#allocation8_spill] sm:$0xff] }
 0x14e   : > { %v2076_v47 = vsel %vm2052_vm7, %v4113_v23, %v1635_v55 }
 0x14f   : > { %2780 = vmatmul.mubr.msk.bf16.vlgmr.msra.gmra.mrb[0].mxu1 %vm2232_vm11, %v2717_v34  ;;  %v1633_v21 = vpop.permute.xlu0 %1632 }
 0x150   : > { %v2073_v54 = vsel %vm2052_vm7, %v4114_v50, %v1633_v21 }
 0x151   : > { %v1679_v19 = vpop.permute.xlu1 %1678 }
 0x152   : > { %v2088_v14 = vsel %vm1083_vm0, %v2070_v38, %v1679_v19 }
 0x153   : > { %v1677_v63 = vpop.permute.xlu0 %1676 }
 0x154   : > { %v2086_v6 = vsel %vm1083_vm0, %v2067_v31, %v1677_v63 }
 0x155   : > { %v1683_v3 = vpop.permute.xlu1 %1682 }
 0x156   : > { %v2092_v5 = vsel %vm1083_vm0, %v2076_v47, %v1683_v3 }
 0x157   : > { %v1681_v8 = vpop.permute.xlu0 %1680 }
 0x158   : > { %v2090_v11 = vsel %vm1083_vm0, %v2073_v54, %v1681_v8 }
 0x159   : > { %v1719_v20 = vpop.permute.xlu1 %1718 }
 0x15a   : > { %v2105_v15 = vsel %vm2093_vm8, %v2088_v14, %v1719_v20 }
 0x15b   : > { %v1717_v16 = vpop.permute.xlu0 %1716 }
 0x15c   : > { %v2103_v9 = vsel %vm2093_vm8, %v2086_v6, %v1717_v16 }
 0x15d   : > { %v534_v30 = vpop.permute.xlu1 %533 }
 0x15e   : > { %v1125_v42 = vsel %vm1083_vm0, %v4115_v27, %v534_v30 }
 0x15f   : > { %v532_v62 = vpop.permute.xlu0 %531 }
 0x160   : > { %v1122_v18 = vsel %vm1083_vm0, %v4116_v44, %v532_v62  ;;  %v4117_v62 = vld [vmem:[#allocation9_spill] sm:$0xff] }
 0x161   : > { %v1723_v49 = vpop.permute.xlu1 %1722 }
 0x162   : > { %v3928_v40 = vsel %vm2093_vm8, %v2092_v5, %v1723_v49 }
 0x163   : > { %v1721_v26 = vpop.permute.xlu0 %1720 }
 0x164   : > { %v3931_v57 = vsel %vm2093_vm8, %v2090_v11, %v1721_v26 }
 0x165   : > { %v1815_v28 = vpop.permute.xlu1 %1814 }
 0x166   : > { %v2121_v3 = vsel %vm1132_vm1, %v2105_v15, %v1815_v28 }
 0x167   : > { %v1813_v45 = vpop.permute.xlu0 %1812 }
 0x168   : > { %v2119_v54 = vsel %vm1132_vm1, %v2103_v9, %v1813_v45  ;;  %v4118_v9 = vld [vmem:[#allocation10_spill] sm:$0xff] }
 0x169   : > { %v538_v41 = vpop.permute.xlu1 %537 }
 0x16a   : > { %v1131_v49 = vsel %vm1083_vm0, %v4117_v62, %v538_v41 }
 0x16b   : > { %v536_v52 = vpop.permute.xlu0 %535 }
 0x16c   : > { %v1128_v45 = vsel %vm1083_vm0, %v4118_v9, %v536_v52 }
 0x16d   : > { %v614_v12 = vpop.permute.xlu1 %613 }
 0x16e   : > { %v1160_v46 = vsel %vm1132_vm1, %v1125_v42, %v614_v12 }
 0x16f   : > { %v612_v53 = vpop.permute.xlu0 %611 }
 0x170   : > { %v1158_v34 = vsel %vm1132_vm1, %v1122_v18, %v612_v53 }
 0x171   : > { %v3933_v35 = vpop.permute.xlu1 %1818 }
 0x173   : > { %v3935_v33 = vpop.permute.xlu0 %1816 }
 0x175   : > { %v1863_v24 = vpop.permute.xlu1 %1862 }
 0x176   : > { %v2138_v5 = vsel %vm2126_vm9, %v2121_v3, %v1863_v24 }
 0x177   : > { %v1861_v36 = vpop.permute.xlu0 %1860 }
 0x178   : > { %v2136_v8 = vsel %vm2126_vm9, %v2119_v54, %v1861_v36 }
 0x179   : > { %v618_v43 = vpop.permute.xlu1 %617 }
 0x17a   : > { %v1164_v12 = vsel %vm1132_vm1, %v1131_v49, %v618_v43 }
 0x17b   : > { %v616_v7 = vpop.permute.xlu0 %615 }
 0x17c   : > { %v1162_v24 = vsel %vm1132_vm1, %v1128_v45, %v616_v7  ;;  %v2123_v7 = vsel %vm1132_vm1, %v3931_v57, %v3935_v33 }
 0x17d   : > { %v806_v29 = vpop.permute.xlu1 %805 }
 0x17e   : > { %v1193_v55 = vsel %vm1165_vm2, %v1160_v46, %v806_v29 }
 0x17f   : > { %v804_v39 = vpop.permute.xlu0 %803 }
 0x180   : > { %v1191_v21 = vsel %vm1165_vm2, %v1158_v34, %v804_v39 }
 0x181   : > { %v1867_v17 = vpop.permute.xlu1 %1866 }
 0x183   : > { %v3937_v13 = vpop.permute.xlu0 %1864 }
 0x185   : > { %v1903_v56 = vpop.permute.xlu1 %1902 }
 0x186   : > { %v2154_v11 = vsel %vm1165_vm2, %v2138_v5, %v1903_v56 }
 0x187   : > { %v1901_v2 = vpop.permute.xlu0 %1900 }
 0x188   : > { %v2152_v20 = vsel %vm1165_vm2, %v2136_v8, %v1901_v2  ;;  %v2125_v2 = vsel %vm1132_vm1, %v3928_v40, %v3933_v35 }
 0x189   : > { %v810_v51 = vpop.permute.xlu1 %809 }
 0x18a   : > { %v1197_v36 = vsel %vm1165_vm2, %v1164_v12, %v810_v51  ;;  %v2142_v51 = vsel %vm2126_vm9, %v2125_v2, %v1867_v17 }
 0x18b   : > { %v808_v61 = vpop.permute.xlu0 %807 }
 0x18c   : > { %v1195_v39 = vsel %vm1165_vm2, %v1162_v24, %v808_v61 }
 0x18d   : > { %v886_v0 = vpop.permute.xlu1 %885 }
 0x18e   : > { %v3939_v25 = vpop.f32.mrb[0].mxu0  ;;  %v1226_v38 = vsel %vm1198_vm3, %v1193_v55, %v886_v0 }
 0x18f   : > { %v3941_v58 = vpop.f32.mrb[1].mxu0  ;;  %v884_v1 = vpop.permute.xlu0 %883 }
 0x190   : > { %v3943_v22 = vpop.f32.mrb[2].mxu0  ;;  %v1224_v31 = vsel %vm1198_vm3, %v1191_v21, %v884_v1  ;;  %v2140_v1 = vsel %vm2126_vm9, %v2123_v7, %v3937_v13 }
 0x191   : > { %v3945_v32 = vpop.f32.mrb[3].mxu0  ;;  %v1907_v48 = vpop.permute.xlu1 %1906 }
 0x192   : > { %v2158_v40 = vsel %vm1165_vm2, %v2142_v51, %v1907_v48 }
 0x193   : > { %v1905_v59 = vpop.permute.xlu0 %1904 }
 0x195   : > { %v1999_v10 = vpop.permute.xlu1 %1998 }
 0x196   : > { %v2171_v16 = vsel %vm2159_vm10, %v2154_v11, %v1999_v10  ;;  %v2156_v10 = vsel %vm1165_vm2, %v2140_v1, %v1905_v59 }
 0x197   : > { %v1997_v60 = vpop.permute.xlu0 %1996 }
 0x198   : > { %v2169_v15 = vsel %vm2159_vm10, %v2152_v20, %v1997_v60 }
 0x199   : > { %v890_v4 = vpop.permute.xlu1 %889 }
 0x19a   : > { %v1230_v41 = vsel %vm1198_vm3, %v1197_v36, %v890_v4 }
 0x19b   : > { %v888_v37 = vpop.permute.xlu0 %887 }
 0x19c   : > { %v1228_v52 = vsel %vm1198_vm3, %v1195_v39, %v888_v37 }
 0x19d   : > { %v1078_v19 = vpop.permute.xlu1 %1077 }
 0x19e   : > { %v1259_v14 = vsel %vm1231_vm4, %v1226_v38, %v1078_v19 }
 0x19f   : > { %v1076_v63 = vpop.permute.xlu0 %1075 }
 0x1a0   : > { %v1257_v6 = vsel %vm1231_vm4, %v1224_v31, %v1076_v63 }
 0x1a1   : > { %v2591_v23 = vcombine.low %v1257_v6, %v1259_v14  ;;  %v2003_v47 = vpop.permute.xlu1 %2002 }
 0x1a2   : > { %v2175_v60 = vsel %vm2159_vm10, %v2158_v40, %v2003_v47 }
 0x1a3   : > { %2769 = vmatprep.mubr.msk.bf16.mxu0 %vm1328_vm5, %v2591_v23  ;;  %v2001_v50 = vpop.permute.xlu0 %2000 }
 0x1a4   : > { %v2173_v27 = vsel %vm2159_vm10, %v2156_v10, %v2001_v50 }
 0x1a5   : > { %v2047_v30 = vpop.permute.xlu1 %2046 }
 0x1a6   : > { %v2187_v26 = vsel %vm1198_vm3, %v2171_v16, %v2047_v30 }
 0x1a7   : > { %v2045_v28 = vpop.permute.xlu0 %2044 }
 0x1a8   : > { %v2185_v53 = vsel %vm1198_vm3, %v2169_v15, %v2045_v28 }
 0x1a9   : > { %v2718_v29 = vcombine.low %v2185_v53, %v2187_v26  ;;  %v1082_v56 = vpop.permute.xlu1 %1081 }
 0x1aa   : > { %v1263_v43 = vsel %vm1231_vm4, %v1230_v41, %v1082_v56 }
 0x1ab   : > { %2783 = vmatprep.mubr.msk.bf16.mxu1 %vm2232_vm11, %v2718_v29  ;;  %v1080_v0 = vpop.permute.xlu0 %1079 }
 0x1ac   : > { %v1261_v61 = vsel %vm1231_vm4, %v1228_v52, %v1080_v0 }
 0x1ad   : > { %v2592_v35 = vcombine.low %v1261_v61, %v1263_v43  ;;  %v2051_v4 = vpop.permute.xlu1 %2050 }
 0x1ae   : > { %v2191_v57 = vsel %vm1198_vm3, %v2175_v60, %v2051_v4 }
 0x1af   : > { %2770 = vmatmul.mubr.msk.bf16.gmra.mrb[12].mxu0 %vm1328_vm5, %v2592_v35  ;;  %v2049_v33 = vpop.permute.xlu0 %2048 }
 0x1b0   : > { %v2189_v17 = vsel %vm1198_vm3, %v2173_v27, %v2049_v33 }
 0x1b1   : > { %v2719_v13 = vcombine.low %v2189_v17, %v2191_v57 }
 0x1b3   : > { %2784 = vmatmul.mubr.msk.bf16.gmra.mrb[4].mxu1 %vm2232_vm11, %v2719_v13 }
 0x1b6   : > { %v2763_v48 = vpop.f32.mrb[4].mxu0 }
 0x1b7   : > { %v1403_v42 = vpop.f32.mrb[5].mxu0 }
 0x1b8   : > { %v2764_v59 = vpop.f32.mrb[6].mxu0 }
 0x1b9   : > { %v1406_v37 = vpop.f32.mrb[7].mxu0 }
 0x21a   : > { %v2767_v44 = vpop.f32.mrb[8].mxu0 }
 0x21b   : > { %v1419_v18 = vpop.f32.mrb[9].mxu0 }
 0x21c   : > { %v2768_v46 = vpop.f32.mrb[10].mxu0 }
 0x21d   : > { %v1422_v34 = vpop.f32.mrb[11].mxu0 }
 0x222   : > { %v2781_v55 = vpop.f32.mrb[0].mxu1 }
 0x223   : > { %v2318_v21 = vadd.f32 %v2781_v55, %v1403_v42  ;;  %v2319_v38 = vadd.f32 %v2781_v55, %v1406_v37  ;;  %v2283_v19 = vpop.f32.mrb[1].mxu1 }
 0x224   : > { %v2314_v31 = vadd.f32 %v2283_v19, %v3941_v58  ;;  %v2315_v14 = vadd.f32 %v2283_v19, %v3945_v32  ;;  %v2782_v63 = vpop.f32.mrb[2].mxu1 }
 0x225   : > { %2334 = vst.msk [vmem:[%s4005_s10 + $0x20] sm:$0xff] %vm1132_vm1, %v2318_v21  ;;  %2335 = vst.msk [vmem:[%s4005_s10 + $0x28] sm:$0xff] %vm1132_vm1, %v2319_v38  ;;  %v2320_v6 = vadd.f32 %v2782_v63, %v2763_v48  ;;  %v2321_v58 = vadd.f32 %v2782_v63, %v2764_v59  ;;  %v2286_v23 = vpop.f32.mrb[3].mxu1 }
 0x226   : > { %2330 = vst.msk [vmem:[%s4005_s10] sm:$0xff] %vm1132_vm1, %v2314_v31  ;;  %2331 = vst.msk [vmem:[%s4005_s10 + $0x8] sm:$0xff] %vm1132_vm1, %v2315_v14  ;;  %v2316_v32 = vadd.f32 %v3939_v25, %v2286_v23  ;;  %v2317_v47 = vadd.f32 %v3943_v22, %v2286_v23 }
 0x227   : > { %2336 = vst.msk [vmem:[%s4005_s10 + $0x30] sm:$0xff] %vm1132_vm1, %v2320_v6  ;;  %2337 = vst.msk [vmem:[%s4005_s10 + $0x38] sm:$0xff] %vm1132_vm1, %v2321_v58 }
 0x228   : > { %2332 = vst.msk [vmem:[%s4005_s10 + $0x10] sm:$0xff] %vm1132_vm1, %v2316_v32  ;;  %2333 = vst.msk [vmem:[%s4005_s10 + $0x18] sm:$0xff] %vm1132_vm1, %v2317_v47 }
 0x282   : > { %v2771_v3 = vpop.f32.mrb[12].mxu0 }
 0x283   : > { %v1435_v50 = vpop.f32.mrb[13].mxu0 }
 0x284   : > { %v2772_v54 = vpop.f32.mrb[14].mxu0 }
 0x285   : > { %v1438_v5 = vpop.f32.mrb[15].mxu0 }
 0x286   : > { %v2785_v8 = vpop.f32.mrb[4].mxu1 }
 0x287   : > { %v2326_v25 = vadd.f32 %v2785_v8, %v1435_v50  ;;  %v2327_v22 = vadd.f32 %v2785_v8, %v1438_v5  ;;  %v2299_v11 = vpop.f32.mrb[5].mxu1 }
 0x288   : > { %v2322_v20 = vadd.f32 %v2299_v11, %v1419_v18  ;;  %v2323_v16 = vadd.f32 %v2299_v11, %v1422_v34  ;;  %v2786_v30 = vpop.f32.mrb[6].mxu1 }
 0x289   : > { %2342 = vst.msk [vmem:[%s4005_s10 + $0x60] sm:$0xff] %vm1132_vm1, %v2326_v25  ;;  %2343 = vst.msk [vmem:[%s4005_s10 + $0x68] sm:$0xff] %vm1132_vm1, %v2327_v22  ;;  %v2328_v62 = vadd.f32 %v2786_v30, %v2771_v3  ;;  %v2329_v49 = vadd.f32 %v2786_v30, %v2772_v54  ;;  %v2302_v15 = vpop.f32.mrb[7].mxu1 }
 0x28a   : > { %2338 = vst.msk [vmem:[%s4005_s10 + $0x40] sm:$0xff] %vm1132_vm1, %v2322_v20  ;;  %2339 = vst.msk [vmem:[%s4005_s10 + $0x48] sm:$0xff] %vm1132_vm1, %v2323_v16  ;;  %v2324_v26 = vadd.f32 %v2767_v44, %v2302_v15  ;;  %v2325_v28 = vadd.f32 %v2768_v46, %v2302_v15 }
 0x28b   : > { %2344 = vst.msk [vmem:[%s4005_s10 + $0x70] sm:$0xff] %vm1132_vm1, %v2328_v62  ;;  %2345 = vst.msk [vmem:[%s4005_s10 + $0x78] sm:$0xff] %vm1132_vm1, %v2329_v49 }
 0x28c   : > { %2340 = vst.msk [vmem:[%s4005_s10 + $0x50] sm:$0xff] %vm1132_vm1, %v2324_v26  ;;  %2341 = vst.msk [vmem:[%s4005_s10 + $0x58] sm:$0xff] %vm1132_vm1, %v2325_v28 }
 0x28d   : > { %3014 = shalt.err (!%p3011_p3)
}
 0x28e   : > { %s3015_s20 = scalar_lea.hbm %s4034_s27, 2048  ;;  %s3019_s29 = scalar_lea.hbm %s4098_s4, 4096 }
 0x28f   : > { %p3016_p4 = scmp.ne.s32.totalorder %s4034_s27, %s3015_s20  ;;  %p3020_p9 = scmp.lt.u32.totalorder %s4034_s27, %s4098_s4 }
 0x290   : > { %p3021_p10 = scmp.lt.u32.totalorder %s3019_s29, %s3015_s20  ;;  %p3023_p12 = scmp.lt.u32.totalorder %s3015_s20, %s4034_s27 }
 0x291   : > { %p3017_p7 = pnand %p3016_p4, %p3139_p5 }
 0x292   : > { %p3022_p11 = por %p3021_p10, %p3020_p9 }
 0x293   : > { %p3018_p8 = pneg %p3017_p7 }
 0x294   : > { %p3024_p13 = por %p3023_p12, %p3022_p11 }
 0x296   : > { %p3025_p0 = pnand %p3024_p13, %p3018_p8 }
 0x298   : > { %3028 = shalt.err (!%p3025_p0)
}
 0x299   : > { %s3075_s10 = smov 128  }
 0x29a   : > { %2790 = dma.vmem_to_hbm [thread:$0]  (%p3139_p5), %s4040_s22, 2048, %s4034_s27, %s4052_s8, %s3075_s10, %s3075_s10, %s3066_s7  }
 0x29b PF: > { %p2796_p1 = scmp.ge.s32.totalorder %s3063_s18, 2  ;;  %s2375_s13 = sand.u32 1, %s3051_s15  }
 0x29c   : > { %s2376_s19 = scalar_lea.sflag [#allocation3], %s2375_s13 }
 0x29d   : > { %p2793_p2 = pnand %p2796_p1, %p3143_p6 }
 0x29f   : > { %3046 = dma.done.wait (!%p2793_p2), %s2376_s19, 2048  }
 0x2a0   : > { %3048 = vsyncadd (!%p2793_p2), %s2376_s19, 4294965248  ;;  %p14_p3 = scmp.ge.s32.totalorder %s3126_s21, 4   ;;  %s4119_s15 = smov %s3055_s16 }
 0x2a1   : > { %s4120_s16 = smov %s3059_s17  ;;  %s4121_s17 = smov %s3137_s24 }
 0x2a2   : > { %s4122_s18 = smov %s3126_s21  ;;  %16 = sbr.rel (!%p14_p3) target bundleno = 3 (0x3), region = 78 }
 0x2a9   :  { %2381 = vsyncpa [#allocation3], 1 }
 0x2aa   :  { %2383 = vsyncpa [#allocation3 + $0x1], 1 }

</bundles_post_ra>
